<compile_context>
chip_gen: v6e
topology: v6e:2x2x1
jax: 0.10.0
libtpu: 0.0.40
codegen_flags: <defaults>
</compile_context>

<pallas_src>
import functools
import math

import jax
import jax.numpy as jnp
from jax.experimental import pallas as pl
from jax.experimental.pallas import tpu as pltpu  # noqa: F401  (kept for parity)

# ---- small config consistent with ModelArgs ----
DIM = 32
N_HEADS = 4
N_KV_HEADS = 2
HEAD_DIM = DIM // N_HEADS          # 8
N_REP = N_HEADS // N_KV_HEADS      # 2
MAX_BATCH = 2
MAX_SEQ = 16
BATCH = 2
SEQ = 8
START_POS = 4                      # kv length T = START_POS + SEQ = 12

Q_OUT = N_HEADS * HEAD_DIM         # 32
KV_OUT = N_KV_HEADS * HEAD_DIM     # 16
QKV_OUT = Q_OUT + 2 * KV_OUT       # 64
HALF_Q = Q_OUT // 2                # 16
HALF_K = KV_OUT // 2               # 8
HALF_D = HEAD_DIM // 2             # 4


# --------------------------- fused Pallas kernel -----------------------------

def _fused_self_attention_kernel(x_ref, wqkv_ref, wo_ref, cos_ref, sin_ref,
                                 o_ref, *, start_pos, batch, seq):
    """Whole SelfAttention forward in one kernel; everything stays in VMEM.

    Layouts:
      x_ref    [B*S, DIM]
      wqkv_ref [DIM, Q_OUT + 2*KV_OUT]  (Wq*scale | Wk | Wv pre-transposed; Q/K
                                         output columns permuted to [real | imag])
      wo_ref   [Q_OUT, DIM]
      cos_ref/sin_ref [B*S, HALF_Q]     RoPE tables, head-replicated, batch-tiled
      o_ref    [B*S, DIM]
    """
    f32 = jnp.float32
    x = x_ref[...]

    # ---- fused QKV projection: one MXU matmul instead of three ----
    qkv = jnp.dot(x, wqkv_ref[...], preferred_element_type=f32)   # [B*S, 64]
    xq = qkv[:, :Q_OUT]                       # [B*S, 32]  (real | imag halves)
    xk = qkv[:, Q_OUT:Q_OUT + KV_OUT]         # [B*S, 16]  (real | imag halves)
    xv = qkv[:, Q_OUT + KV_OUT:QKV_OUT]       # [B*S, 16]  (original layout)

    cos = cos_ref[...]
    sin = sin_ref[...]

    # ---- RoPE in real arithmetic on the whole slab (VPU elementwise) ----
    # 1/sqrt(head_dim) was already folded into the Q weight columns.
    q_re = xq[:, :HALF_Q]
    q_im = xq[:, HALF_Q:]
    qr = q_re * cos - q_im * sin
    qi = q_re * sin + q_im * cos

    cos_k = cos[:, :HALF_K]
    sin_k = sin[:, :HALF_K]
    k_re = xk[:, :HALF_K]
    k_im = xk[:, HALF_K:]
    kr = k_re * cos_k - k_im * sin_k
    ki = k_re * sin_k + k_im * cos_k

    wo = wo_ref[...]

    # ---- attention + output projection, all (batch, head) pairs unrolled ----
    # Zero-initialized KV cache rows [0, start_pos) give score==0 softmax
    # columns and zero output contribution -> handled analytically.
    dn = (((1,), (1,)), ((), ()))   # contract last dims: A @ B^T
    for b in range(batch):
        rows = slice(b * seq, (b + 1) * seq)
        acc = jnp.zeros((seq, DIM), f32)
        for h in range(N_HEADS):
            hk = h // N_REP                       # GQA: shared KV head (addressing only)
            cq = slice(h * HALF_D, (h + 1) * HALF_D)
            ck = slice(hk * HALF_D, (hk + 1) * HALF_D)
            s = (jax.lax.dot_general(qr[rows, cq], kr[rows, ck], dn,
                                     preferred_element_type=f32)
                 + jax.lax.dot_general(qi[rows, cq], ki[rows, ck], dn,
                                       preferred_element_type=f32))     # [S, S]
            m = jnp.maximum(jnp.max(s, axis=-1, keepdims=True), 0.0)
            e = jnp.exp(s - m)
            denom = jnp.sum(e, axis=-1, keepdims=True) + start_pos * jnp.exp(-m)
            p = e / denom
            v_h = xv[rows, hk * HEAD_DIM:(hk + 1) * HEAD_DIM]            # [S, Dh]
            o_h = jnp.dot(p, v_h, preferred_element_type=f32)            # [S, Dh]
            # Fold this head's output straight into the output projection:
            acc = acc + jnp.dot(o_h, wo[h * HEAD_DIM:(h + 1) * HEAD_DIM, :],
                                preferred_element_type=f32)
        # single lane-dense [S, DIM] store per batch, no scratch round trip
        o_ref[rows, :] = acc.astype(o_ref.dtype)


# --------------------------- wrapper ------------------------------------------

def _rope_half_permutation(n_heads):
    """Permute per-head interleaved (re, im) pairs into [all-real | all-imag]."""
    half = HEAD_DIM // 2
    real = [h * HEAD_DIM + 2 * p for h in range(n_heads) for p in range(half)]
    imag = [h * HEAD_DIM + 2 * p + 1 for h in range(n_heads) for p in range(half)]
    return jnp.array(real + imag, dtype=jnp.int32)


def self_attention_forward(x, start_pos, freqs_complex, params):
    """x: [B, S, DIM] float32. Returns [B, S, DIM]. Single fused pallas_call."""
    B, S, _ = x.shape
    wq_t, wk_t, wv_t, wo_t = params          # each [in, out]

    # Trace-time weight prep (weights only): fuse Wq|Wk|Wv, permute Q/K output
    # columns to [real-half | imag-half], and fold 1/sqrt(head_dim) into Wq.
    # Per-head scores are invariant because Q and K share the permutation.
    scale = 1.0 / math.sqrt(HEAD_DIM)
    wq_p = wq_t[:, _rope_half_permutation(N_HEADS)] * scale
    wk_p = wk_t[:, _rope_half_permutation(N_KV_HEADS)]
    wqkv = jnp.concatenate([wq_p, wk_p, wv_t], axis=1)            # [DIM, 64]

    # RoPE tables in real arithmetic, replicated per head and tiled per batch.
    cos_base = jnp.real(freqs_complex).astype(jnp.float32)        # [S, Dh/2]
    sin_base = jnp.imag(freqs_complex).astype(jnp.float32)
    cos_tab = jnp.tile(jnp.tile(cos_base, (1, N_HEADS)), (B, 1))  # [B*S, 16]
    sin_tab = jnp.tile(jnp.tile(sin_base, (1, N_HEADS)), (B, 1))

    x2d = x.reshape(B * S, DIM)
    kern = functools.partial(
        _fused_self_attention_kernel,
        start_pos=start_pos, batch=B, seq=S)

    out2d = pl.pallas_call(
        kern,
        out_shape=jax.ShapeDtypeStruct((B * S, DIM), x.dtype),
        grid=(1,),
        in_specs=[pl.BlockSpec((B * S, DIM), lambda i: (0, 0)),
                  pl.BlockSpec((DIM, QKV_OUT), lambda i: (0, 0)),
                  pl.BlockSpec((Q_OUT, DIM), lambda i: (0, 0)),
                  pl.BlockSpec((B * S, HALF_Q), lambda i: (0, 0)),
                  pl.BlockSpec((B * S, HALF_Q), lambda i: (0, 0))],
        out_specs=pl.BlockSpec((B * S, DIM), lambda i: (0, 0)),
    )(x2d, wqkv, wo_t, cos_tab, sin_tab)
    return out2d.reshape(B, S, DIM)


# --------------------------- pure-JAX reference (matches PyTorch) -------------

def apply_rot_emb(x, freqs_complex):
    xc = x.astype(jnp.float32).reshape(*x.shape[:-1], -1, 2)
    xc = jax.lax.complex(xc[..., 0], xc[..., 1])            # [B, S, H, Dh/2]
    fc = freqs_complex[None, :, None, :]                    # [1, S, 1, Dh/2]
    xr = xc * fc
    out = jnp.stack([jnp.real(xr), jnp.imag(xr)], axis=-1).reshape(x.shape)
    return out.astype(x.dtype)


def repeat_kv(x, n_rep):
    if n_rep == 1:
        return x
    b, s, nkv, d = x.shape
    return jnp.broadcast_to(
        x[:, :, :, None, :], (b, s, nkv, n_rep, d)).reshape(b, s, nkv * n_rep, d)


def reference_forward(x, start_pos, freqs_complex, params):
    B, S, _ = x.shape
    wq_t, wk_t, wv_t, wo_t = params
    xq = (x @ wq_t).reshape(B, S, N_HEADS, HEAD_DIM)
    xk = (x @ wk_t).reshape(B, S, N_KV_HEADS, HEAD_DIM)
    xv = (x @ wv_t).reshape(B, S, N_KV_HEADS, HEAD_DIM)
    xq = apply_rot_emb(xq, freqs_complex)
    xk = apply_rot_emb(xk, freqs_complex)
    cache_k = jnp.zeros((MAX_BATCH, MAX_SEQ, N_KV_HEADS, HEAD_DIM), jnp.float32)
    cache_v = jnp.zeros((MAX_BATCH, MAX_SEQ, N_KV_HEADS, HEAD_DIM), jnp.float32)
    cache_k = jax.lax.dynamic_update_slice(cache_k, xk, (0, start_pos, 0, 0))
    cache_v = jax.lax.dynamic_update_slice(cache_v, xv, (0, start_pos, 0, 0))
    keys = repeat_kv(cache_k[:B, :start_pos + S], N_REP)
    values = repeat_kv(cache_v[:B, :start_pos + S], N_REP)
    q = jnp.transpose(xq, (0, 2, 1, 3))
    k = jnp.transpose(keys, (0, 2, 1, 3))
    v = jnp.transpose(values, (0, 2, 1, 3))
    s = jnp.einsum('bhsd,bhtd->bhst', q, k) / math.sqrt(HEAD_DIM)
    p = jax.nn.softmax(s.astype(jnp.float32), axis=-1)
    o = jnp.einsum('bhst,bhtd->bhsd', p, v)
    o = jnp.transpose(o, (0, 2, 1, 3)).reshape(B, S, -1)
    return o @ wo_t


# --------------------------- main ---------------------------------------------

if __name__ == "__main__":
    key = jax.random.PRNGKey(0)
    kx, kq, kk, kv, ko = jax.random.split(key, 5)

    x = jax.random.normal(kx, (BATCH, SEQ, DIM), jnp.float32)

    # deterministic weight init ([in, out] = W^T of nn.Linear's [out, in])
    wq_t = 0.02 * jax.random.normal(kq, (DIM, N_HEADS * HEAD_DIM), jnp.float32)
    wk_t = 0.02 * jax.random.normal(kk, (DIM, N_KV_HEADS * HEAD_DIM), jnp.float32)
    wv_t = 0.02 * jax.random.normal(kv, (DIM, N_KV_HEADS * HEAD_DIM), jnp.float32)
    wo_t = 0.02 * jax.random.normal(ko, (N_HEADS * HEAD_DIM, DIM), jnp.float32)
    params = (wq_t, wk_t, wv_t, wo_t)

    # RoPE frequencies for positions [START_POS, START_POS + SEQ)
    theta = 10000.0 ** (-jnp.arange(0, HEAD_DIM, 2, dtype=jnp.float32) / HEAD_DIM)
    pos = jnp.arange(START_POS, START_POS + SEQ, dtype=jnp.float32)
    angles = pos[:, None] * theta[None, :]                        # [S, Dh/2]
    freqs_complex = jnp.cos(angles) + 1j * jnp.sin(angles)        # complex64

    out = self_attention_forward(x, START_POS, freqs_complex, params)
    out = jax.block_until_ready(out)

    ref = reference_forward(x, START_POS, freqs_complex, params)
    assert out.shape == (BATCH, SEQ, DIM)
    assert jnp.allclose(out, ref, atol=1e-5, rtol=1e-5), \
        f"max abs err {jnp.max(jnp.abs(out - ref))}"

    print("KERNEL_OK")
</pallas_src>

<mosaic_0001>
module attributes {stable_mosaic.version = 11 : i64} {
  func.func @_fused_self_attention_kernel(%arg0: i32, %arg1: memref<16x32xf32, #tpu.memory_space<vmem>>, %arg2: memref<32x64xf32, #tpu.memory_space<vmem>>, %arg3: memref<32x32xf32, #tpu.memory_space<vmem>>, %arg4: memref<16x16xf32, #tpu.memory_space<vmem>>, %arg5: memref<16x16xf32, #tpu.memory_space<vmem>>, %arg6: memref<16x32xf32, #tpu.memory_space<vmem>>) attributes {dimension_semantics = [#tpu.dimension_semantics<arbitrary>], iteration_bounds = array<i64: 1>, scalar_prefetch = 0 : i64, scratch_operands = 0 : i64, tpu.core_type = #tpu.core_type<tc>, window_params = [{pipeline_mode = #tpu.pipeline_mode<synchronous>, transform_indices = @transform_0, window_bounds = array<i64: 16, 32>}, {pipeline_mode = #tpu.pipeline_mode<synchronous>, transform_indices = @transform_1, window_bounds = array<i64: 32, 64>}, {pipeline_mode = #tpu.pipeline_mode<synchronous>, transform_indices = @transform_2, window_bounds = array<i64: 32, 32>}, {pipeline_mode = #tpu.pipeline_mode<synchronous>, transform_indices = @transform_3, window_bounds = array<i64: 16, 16>}, {pipeline_mode = #tpu.pipeline_mode<synchronous>, transform_indices = @transform_4, window_bounds = array<i64: 16, 16>}, {pipeline_mode = #tpu.pipeline_mode<synchronous>, transform_indices = @transform_5, window_bounds = array<i64: 16, 32>}]} {
    %c0 = arith.constant 0 : index
    %c0_0 = arith.constant 0 : index
    %0 = vector.load %arg1[%c0, %c0_0] : memref<16x32xf32, #tpu.memory_space<vmem>>, vector<16x32xf32>
    %c0_1 = arith.constant 0 : index
    %c0_2 = arith.constant 0 : index
    %1 = vector.load %arg2[%c0_1, %c0_2] : memref<32x64xf32, #tpu.memory_space<vmem>>, vector<32x64xf32>
    %cst = arith.constant dense<0.000000e+00> : vector<16x64xf32>
    %2 = tpu.matmul %0, %1, %cst {dimension_numbers = #tpu.dot_dimension_numbers<[1], [0], [0], [1], [0, 0, 1, 1], [], []>} : vector<16x32xf32>, vector<32x64xf32>, vector<16x64xf32> -> vector<16x64xf32>
    %3 = vector.extract_strided_slice %2 {offsets = [0, 0], sizes = [16, 32], strides = [1, 1]} : vector<16x64xf32> to vector<16x32xf32>
    %4 = vector.extract_strided_slice %2 {offsets = [0, 32], sizes = [16, 16], strides = [1, 1]} : vector<16x64xf32> to vector<16x16xf32>
    %5 = vector.extract_strided_slice %2 {offsets = [0, 48], sizes = [16, 16], strides = [1, 1]} : vector<16x64xf32> to vector<16x16xf32>
    %c0_3 = arith.constant 0 : index
    %c0_4 = arith.constant 0 : index
    %6 = vector.load %arg4[%c0_3, %c0_4] : memref<16x16xf32, #tpu.memory_space<vmem>>, vector<16x16xf32>
    %c0_5 = arith.constant 0 : index
    %c0_6 = arith.constant 0 : index
    %7 = vector.load %arg5[%c0_5, %c0_6] : memref<16x16xf32, #tpu.memory_space<vmem>>, vector<16x16xf32>
    %8 = vector.extract_strided_slice %3 {offsets = [0, 0], sizes = [16, 16], strides = [1, 1]} : vector<16x32xf32> to vector<16x16xf32>
    %9 = vector.extract_strided_slice %3 {offsets = [0, 16], sizes = [16, 16], strides = [1, 1]} : vector<16x32xf32> to vector<16x16xf32>
    %10 = arith.mulf %8, %6 : vector<16x16xf32>
    %11 = arith.mulf %9, %7 : vector<16x16xf32>
    %12 = arith.subf %10, %11 : vector<16x16xf32>
    %13 = arith.mulf %8, %7 : vector<16x16xf32>
    %14 = arith.mulf %9, %6 : vector<16x16xf32>
    %15 = arith.addf %13, %14 : vector<16x16xf32>
    %16 = vector.extract_strided_slice %6 {offsets = [0, 0], sizes = [16, 8], strides = [1, 1]} : vector<16x16xf32> to vector<16x8xf32>
    %17 = vector.extract_strided_slice %7 {offsets = [0, 0], sizes = [16, 8], strides = [1, 1]} : vector<16x16xf32> to vector<16x8xf32>
    %18 = vector.extract_strided_slice %4 {offsets = [0, 0], sizes = [16, 8], strides = [1, 1]} : vector<16x16xf32> to vector<16x8xf32>
    %19 = vector.extract_strided_slice %4 {offsets = [0, 8], sizes = [16, 8], strides = [1, 1]} : vector<16x16xf32> to vector<16x8xf32>
    %20 = arith.mulf %18, %16 : vector<16x8xf32>
    %21 = arith.mulf %19, %17 : vector<16x8xf32>
    %22 = arith.subf %20, %21 : vector<16x8xf32>
    %23 = arith.mulf %18, %17 : vector<16x8xf32>
    %24 = arith.mulf %19, %16 : vector<16x8xf32>
    %25 = arith.addf %23, %24 : vector<16x8xf32>
    %c0_7 = arith.constant 0 : index
    %c0_8 = arith.constant 0 : index
    %26 = vector.load %arg3[%c0_7, %c0_8] : memref<32x32xf32, #tpu.memory_space<vmem>>, vector<32x32xf32>
    %cst_9 = arith.constant 0.000000e+00 : f32
    %27 = vector.broadcast %cst_9 : f32 to vector<8x32xf32>
    %28 = vector.extract_strided_slice %12 {offsets = [0, 0], sizes = [8, 4], strides = [1, 1]} : vector<16x16xf32> to vector<8x4xf32>
    %29 = vector.extract_strided_slice %22 {offsets = [0, 0], sizes = [8, 4], strides = [1, 1]} : vector<16x8xf32> to vector<8x4xf32>
    %cst_10 = arith.constant dense<0.000000e+00> : vector<8x8xf32>
    %30 = tpu.matmul %28, %29, %cst_10 {dimension_numbers = #tpu.dot_dimension_numbers<[1], [1], [0], [0], [0, 0, 1, 0], [], []>} : vector<8x4xf32>, vector<8x4xf32>, vector<8x8xf32> -> vector<8x8xf32>
    %31 = vector.extract_strided_slice %15 {offsets = [0, 0], sizes = [8, 4], strides = [1, 1]} : vector<16x16xf32> to vector<8x4xf32>
    %32 = vector.extract_strided_slice %25 {offsets = [0, 0], sizes = [8, 4], strides = [1, 1]} : vector<16x8xf32> to vector<8x4xf32>
    %cst_11 = arith.constant dense<0.000000e+00> : vector<8x8xf32>
    %33 = tpu.matmul %31, %32, %cst_11 {dimension_numbers = #tpu.dot_dimension_numbers<[1], [1], [0], [0], [0, 0, 1, 0], [], []>} : vector<8x4xf32>, vector<8x4xf32>, vector<8x8xf32> -> vector<8x8xf32>
    %34 = arith.addf %30, %33 : vector<8x8xf32>
    %cst_12 = arith.constant dense<0xFF800000> : vector<8xf32>
    %35 = vector.multi_reduction <maximumf>, %34, %cst_12 [1] : vector<8x8xf32> to vector<8xf32>
    %36 = vector.shape_cast %35 : vector<8xf32> to vector<8x1xf32>
    %cst_13 = arith.constant 0.000000e+00 : f32
    %37 = vector.broadcast %cst_13 : f32 to vector<8x1xf32>
    %38 = arith.maximumf %36, %37 : vector<8x1xf32>
    %39 = vector.broadcast %38 : vector<8x1xf32> to vector<8x8xf32>
    %40 = arith.subf %34, %39 : vector<8x8xf32>
    %41 = math.exp %40 : vector<8x8xf32>
    %cst_14 = arith.constant dense<0.000000e+00> : vector<8xf32>
    %42 = vector.multi_reduction <add>, %41, %cst_14 [1] : vector<8x8xf32> to vector<8xf32>
    %43 = vector.shape_cast %42 : vector<8xf32> to vector<8x1xf32>
    %cst_15 = arith.constant 0.000000e+00 : f32
    %44 = vector.broadcast %cst_15 : f32 to vector<8x1xf32>
    %45 = arith.subf %44, %38 : vector<8x1xf32>
    %46 = math.exp %45 : vector<8x1xf32>
    %cst_16 = arith.constant 4.000000e+00 : f32
    %47 = vector.broadcast %cst_16 : f32 to vector<8x1xf32>
    %48 = arith.mulf %47, %46 : vector<8x1xf32>
    %49 = arith.addf %43, %48 : vector<8x1xf32>
    %50 = vector.broadcast %49 : vector<8x1xf32> to vector<8x8xf32>
    %51 = arith.divf %41, %50 : vector<8x8xf32>
    %52 = vector.extract_strided_slice %5 {offsets = [0, 0], sizes = [8, 8], strides = [1, 1]} : vector<16x16xf32> to vector<8x8xf32>
    %cst_17 = arith.constant dense<0.000000e+00> : vector<8x8xf32>
    %53 = tpu.matmul %51, %52, %cst_17 {dimension_numbers = #tpu.dot_dimension_numbers<[1], [0], [0], [1], [0, 0, 1, 1], [], []>} : vector<8x8xf32>, vector<8x8xf32>, vector<8x8xf32> -> vector<8x8xf32>
    %54 = vector.extract_strided_slice %26 {offsets = [0, 0], sizes = [8, 32], strides = [1, 1]} : vector<32x32xf32> to vector<8x32xf32>
    %cst_18 = arith.constant dense<0.000000e+00> : vector<8x32xf32>
    %55 = tpu.matmul %53, %54, %cst_18 {dimension_numbers = #tpu.dot_dimension_numbers<[1], [0], [0], [1], [0, 0, 1, 1], [], []>} : vector<8x8xf32>, vector<8x32xf32>, vector<8x32xf32> -> vector<8x32xf32>
    %56 = arith.addf %27, %55 : vector<8x32xf32>
    %57 = vector.extract_strided_slice %12 {offsets = [0, 4], sizes = [8, 4], strides = [1, 1]} : vector<16x16xf32> to vector<8x4xf32>
    %58 = vector.extract_strided_slice %22 {offsets = [0, 0], sizes = [8, 4], strides = [1, 1]} : vector<16x8xf32> to vector<8x4xf32>
    %cst_19 = arith.constant dense<0.000000e+00> : vector<8x8xf32>
    %59 = tpu.matmul %57, %58, %cst_19 {dimension_numbers = #tpu.dot_dimension_numbers<[1], [1], [0], [0], [0, 0, 1, 0], [], []>} : vector<8x4xf32>, vector<8x4xf32>, vector<8x8xf32> -> vector<8x8xf32>
    %60 = vector.extract_strided_slice %15 {offsets = [0, 4], sizes = [8, 4], strides = [1, 1]} : vector<16x16xf32> to vector<8x4xf32>
    %61 = vector.extract_strided_slice %25 {offsets = [0, 0], sizes = [8, 4], strides = [1, 1]} : vector<16x8xf32> to vector<8x4xf32>
    %cst_20 = arith.constant dense<0.000000e+00> : vector<8x8xf32>
    %62 = tpu.matmul %60, %61, %cst_20 {dimension_numbers = #tpu.dot_dimension_numbers<[1], [1], [0], [0], [0, 0, 1, 0], [], []>} : vector<8x4xf32>, vector<8x4xf32>, vector<8x8xf32> -> vector<8x8xf32>
    %63 = arith.addf %59, %62 : vector<8x8xf32>
    %cst_21 = arith.constant dense<0xFF800000> : vector<8xf32>
    %64 = vector.multi_reduction <maximumf>, %63, %cst_21 [1] : vector<8x8xf32> to vector<8xf32>
    %65 = vector.shape_cast %64 : vector<8xf32> to vector<8x1xf32>
    %cst_22 = arith.constant 0.000000e+00 : f32
    %66 = vector.broadcast %cst_22 : f32 to vector<8x1xf32>
    %67 = arith.maximumf %65, %66 : vector<8x1xf32>
    %68 = vector.broadcast %67 : vector<8x1xf32> to vector<8x8xf32>
    %69 = arith.subf %63, %68 : vector<8x8xf32>
    %70 = math.exp %69 : vector<8x8xf32>
    %cst_23 = arith.constant dense<0.000000e+00> : vector<8xf32>
    %71 = vector.multi_reduction <add>, %70, %cst_23 [1] : vector<8x8xf32> to vector<8xf32>
    %72 = vector.shape_cast %71 : vector<8xf32> to vector<8x1xf32>
    %cst_24 = arith.constant 0.000000e+00 : f32
    %73 = vector.broadcast %cst_24 : f32 to vector<8x1xf32>
    %74 = arith.subf %73, %67 : vector<8x1xf32>
    %75 = math.exp %74 : vector<8x1xf32>
    %cst_25 = arith.constant 4.000000e+00 : f32
    %76 = vector.broadcast %cst_25 : f32 to vector<8x1xf32>
    %77 = arith.mulf %76, %75 : vector<8x1xf32>
    %78 = arith.addf %72, %77 : vector<8x1xf32>
    %79 = vector.broadcast %78 : vector<8x1xf32> to vector<8x8xf32>
    %80 = arith.divf %70, %79 : vector<8x8xf32>
    %81 = vector.extract_strided_slice %5 {offsets = [0, 0], sizes = [8, 8], strides = [1, 1]} : vector<16x16xf32> to vector<8x8xf32>
    %cst_26 = arith.constant dense<0.000000e+00> : vector<8x8xf32>
    %82 = tpu.matmul %80, %81, %cst_26 {dimension_numbers = #tpu.dot_dimension_numbers<[1], [0], [0], [1], [0, 0, 1, 1], [], []>} : vector<8x8xf32>, vector<8x8xf32>, vector<8x8xf32> -> vector<8x8xf32>
    %83 = vector.extract_strided_slice %26 {offsets = [8, 0], sizes = [8, 32], strides = [1, 1]} : vector<32x32xf32> to vector<8x32xf32>
    %cst_27 = arith.constant dense<0.000000e+00> : vector<8x32xf32>
    %84 = tpu.matmul %82, %83, %cst_27 {dimension_numbers = #tpu.dot_dimension_numbers<[1], [0], [0], [1], [0, 0, 1, 1], [], []>} : vector<8x8xf32>, vector<8x32xf32>, vector<8x32xf32> -> vector<8x32xf32>
    %85 = arith.addf %56, %84 : vector<8x32xf32>
    %86 = vector.extract_strided_slice %12 {offsets = [0, 8], sizes = [8, 4], strides = [1, 1]} : vector<16x16xf32> to vector<8x4xf32>
    %87 = vector.extract_strided_slice %22 {offsets = [0, 4], sizes = [8, 4], strides = [1, 1]} : vector<16x8xf32> to vector<8x4xf32>
    %cst_28 = arith.constant dense<0.000000e+00> : vector<8x8xf32>
    %88 = tpu.matmul %86, %87, %cst_28 {dimension_numbers = #tpu.dot_dimension_numbers<[1], [1], [0], [0], [0, 0, 1, 0], [], []>} : vector<8x4xf32>, vector<8x4xf32>, vector<8x8xf32> -> vector<8x8xf32>
    %89 = vector.extract_strided_slice %15 {offsets = [0, 8], sizes = [8, 4], strides = [1, 1]} : vector<16x16xf32> to vector<8x4xf32>
    %90 = vector.extract_strided_slice %25 {offsets = [0, 4], sizes = [8, 4], strides = [1, 1]} : vector<16x8xf32> to vector<8x4xf32>
    %cst_29 = arith.constant dense<0.000000e+00> : vector<8x8xf32>
    %91 = tpu.matmul %89, %90, %cst_29 {dimension_numbers = #tpu.dot_dimension_numbers<[1], [1], [0], [0], [0, 0, 1, 0], [], []>} : vector<8x4xf32>, vector<8x4xf32>, vector<8x8xf32> -> vector<8x8xf32>
    %92 = arith.addf %88, %91 : vector<8x8xf32>
    %cst_30 = arith.constant dense<0xFF800000> : vector<8xf32>
    %93 = vector.multi_reduction <maximumf>, %92, %cst_30 [1] : vector<8x8xf32> to vector<8xf32>
    %94 = vector.shape_cast %93 : vector<8xf32> to vector<8x1xf32>
    %cst_31 = arith.constant 0.000000e+00 : f32
    %95 = vector.broadcast %cst_31 : f32 to vector<8x1xf32>
    %96 = arith.maximumf %94, %95 : vector<8x1xf32>
    %97 = vector.broadcast %96 : vector<8x1xf32> to vector<8x8xf32>
    %98 = arith.subf %92, %97 : vector<8x8xf32>
    %99 = math.exp %98 : vector<8x8xf32>
    %cst_32 = arith.constant dense<0.000000e+00> : vector<8xf32>
    %100 = vector.multi_reduction <add>, %99, %cst_32 [1] : vector<8x8xf32> to vector<8xf32>
    %101 = vector.shape_cast %100 : vector<8xf32> to vector<8x1xf32>
    %cst_33 = arith.constant 0.000000e+00 : f32
    %102 = vector.broadcast %cst_33 : f32 to vector<8x1xf32>
    %103 = arith.subf %102, %96 : vector<8x1xf32>
    %104 = math.exp %103 : vector<8x1xf32>
    %cst_34 = arith.constant 4.000000e+00 : f32
    %105 = vector.broadcast %cst_34 : f32 to vector<8x1xf32>
    %106 = arith.mulf %105, %104 : vector<8x1xf32>
    %107 = arith.addf %101, %106 : vector<8x1xf32>
    %108 = vector.broadcast %107 : vector<8x1xf32> to vector<8x8xf32>
    %109 = arith.divf %99, %108 : vector<8x8xf32>
    %110 = vector.extract_strided_slice %5 {offsets = [0, 8], sizes = [8, 8], strides = [1, 1]} : vector<16x16xf32> to vector<8x8xf32>
    %cst_35 = arith.constant dense<0.000000e+00> : vector<8x8xf32>
    %111 = tpu.matmul %109, %110, %cst_35 {dimension_numbers = #tpu.dot_dimension_numbers<[1], [0], [0], [1], [0, 0, 1, 1], [], []>} : vector<8x8xf32>, vector<8x8xf32>, vector<8x8xf32> -> vector<8x8xf32>
    %112 = vector.extract_strided_slice %26 {offsets = [16, 0], sizes = [8, 32], strides = [1, 1]} : vector<32x32xf32> to vector<8x32xf32>
    %cst_36 = arith.constant dense<0.000000e+00> : vector<8x32xf32>
    %113 = tpu.matmul %111, %112, %cst_36 {dimension_numbers = #tpu.dot_dimension_numbers<[1], [0], [0], [1], [0, 0, 1, 1], [], []>} : vector<8x8xf32>, vector<8x32xf32>, vector<8x32xf32> -> vector<8x32xf32>
    %114 = arith.addf %85, %113 : vector<8x32xf32>
    %115 = vector.extract_strided_slice %12 {offsets = [0, 12], sizes = [8, 4], strides = [1, 1]} : vector<16x16xf32> to vector<8x4xf32>
    %116 = vector.extract_strided_slice %22 {offsets = [0, 4], sizes = [8, 4], strides = [1, 1]} : vector<16x8xf32> to vector<8x4xf32>
    %cst_37 = arith.constant dense<0.000000e+00> : vector<8x8xf32>
    %117 = tpu.matmul %115, %116, %cst_37 {dimension_numbers = #tpu.dot_dimension_numbers<[1], [1], [0], [0], [0, 0, 1, 0], [], []>} : vector<8x4xf32>, vector<8x4xf32>, vector<8x8xf32> -> vector<8x8xf32>
    %118 = vector.extract_strided_slice %15 {offsets = [0, 12], sizes = [8, 4], strides = [1, 1]} : vector<16x16xf32> to vector<8x4xf32>
    %119 = vector.extract_strided_slice %25 {offsets = [0, 4], sizes = [8, 4], strides = [1, 1]} : vector<16x8xf32> to vector<8x4xf32>
    %cst_38 = arith.constant dense<0.000000e+00> : vector<8x8xf32>
    %120 = tpu.matmul %118, %119, %cst_38 {dimension_numbers = #tpu.dot_dimension_numbers<[1], [1], [0], [0], [0, 0, 1, 0], [], []>} : vector<8x4xf32>, vector<8x4xf32>, vector<8x8xf32> -> vector<8x8xf32>
    %121 = arith.addf %117, %120 : vector<8x8xf32>
    %cst_39 = arith.constant dense<0xFF800000> : vector<8xf32>
    %122 = vector.multi_reduction <maximumf>, %121, %cst_39 [1] : vector<8x8xf32> to vector<8xf32>
    %123 = vector.shape_cast %122 : vector<8xf32> to vector<8x1xf32>
    %cst_40 = arith.constant 0.000000e+00 : f32
    %124 = vector.broadcast %cst_40 : f32 to vector<8x1xf32>
    %125 = arith.maximumf %123, %124 : vector<8x1xf32>
    %126 = vector.broadcast %125 : vector<8x1xf32> to vector<8x8xf32>
    %127 = arith.subf %121, %126 : vector<8x8xf32>
    %128 = math.exp %127 : vector<8x8xf32>
    %cst_41 = arith.constant dense<0.000000e+00> : vector<8xf32>
    %129 = vector.multi_reduction <add>, %128, %cst_41 [1] : vector<8x8xf32> to vector<8xf32>
    %130 = vector.shape_cast %129 : vector<8xf32> to vector<8x1xf32>
    %cst_42 = arith.constant 0.000000e+00 : f32
    %131 = vector.broadcast %cst_42 : f32 to vector<8x1xf32>
    %132 = arith.subf %131, %125 : vector<8x1xf32>
    %133 = math.exp %132 : vector<8x1xf32>
    %cst_43 = arith.constant 4.000000e+00 : f32
    %134 = vector.broadcast %cst_43 : f32 to vector<8x1xf32>
    %135 = arith.mulf %134, %133 : vector<8x1xf32>
    %136 = arith.addf %130, %135 : vector<8x1xf32>
    %137 = vector.broadcast %136 : vector<8x1xf32> to vector<8x8xf32>
    %138 = arith.divf %128, %137 : vector<8x8xf32>
    %139 = vector.extract_strided_slice %5 {offsets = [0, 8], sizes = [8, 8], strides = [1, 1]} : vector<16x16xf32> to vector<8x8xf32>
    %cst_44 = arith.constant dense<0.000000e+00> : vector<8x8xf32>
    %140 = tpu.matmul %138, %139, %cst_44 {dimension_numbers = #tpu.dot_dimension_numbers<[1], [0], [0], [1], [0, 0, 1, 1], [], []>} : vector<8x8xf32>, vector<8x8xf32>, vector<8x8xf32> -> vector<8x8xf32>
    %141 = vector.extract_strided_slice %26 {offsets = [24, 0], sizes = [8, 32], strides = [1, 1]} : vector<32x32xf32> to vector<8x32xf32>
    %cst_45 = arith.constant dense<0.000000e+00> : vector<8x32xf32>
    %142 = tpu.matmul %140, %141, %cst_45 {dimension_numbers = #tpu.dot_dimension_numbers<[1], [0], [0], [1], [0, 0, 1, 1], [], []>} : vector<8x8xf32>, vector<8x32xf32>, vector<8x32xf32> -> vector<8x32xf32>
    %143 = arith.addf %114, %142 : vector<8x32xf32>
    %c0_46 = arith.constant 0 : index
    %c0_47 = arith.constant 0 : index
    %144 = vector.load %arg6[%c0_46, %c0_47] : memref<16x32xf32, #tpu.memory_space<vmem>>, vector<8x32xf32>
    tpu.vector_store %arg6[%c0_46, %c0_47], %143 {strides = array<i32>} : memref<16x32xf32, #tpu.memory_space<vmem>>, vector<8x32xf32>,
    %cst_48 = arith.constant 0.000000e+00 : f32
    %145 = vector.broadcast %cst_48 : f32 to vector<8x32xf32>
    %146 = vector.extract_strided_slice %12 {offsets = [8, 0], sizes = [8, 4], strides = [1, 1]} : vector<16x16xf32> to vector<8x4xf32>
    %147 = vector.extract_strided_slice %22 {offsets = [8, 0], sizes = [8, 4], strides = [1, 1]} : vector<16x8xf32> to vector<8x4xf32>
    %cst_49 = arith.constant dense<0.000000e+00> : vector<8x8xf32>
    %148 = tpu.matmul %146, %147, %cst_49 {dimension_numbers = #tpu.dot_dimension_numbers<[1], [1], [0], [0], [0, 0, 1, 0], [], []>} : vector<8x4xf32>, vector<8x4xf32>, vector<8x8xf32> -> vector<8x8xf32>
    %149 = vector.extract_strided_slice %15 {offsets = [8, 0], sizes = [8, 4], strides = [1, 1]} : vector<16x16xf32> to vector<8x4xf32>
    %150 = vector.extract_strided_slice %25 {offsets = [8, 0], sizes = [8, 4], strides = [1, 1]} : vector<16x8xf32> to vector<8x4xf32>
    %cst_50 = arith.constant dense<0.000000e+00> : vector<8x8xf32>
    %151 = tpu.matmul %149, %150, %cst_50 {dimension_numbers = #tpu.dot_dimension_numbers<[1], [1], [0], [0], [0, 0, 1, 0], [], []>} : vector<8x4xf32>, vector<8x4xf32>, vector<8x8xf32> -> vector<8x8xf32>
    %152 = arith.addf %148, %151 : vector<8x8xf32>
    %cst_51 = arith.constant dense<0xFF800000> : vector<8xf32>
    %153 = vector.multi_reduction <maximumf>, %152, %cst_51 [1] : vector<8x8xf32> to vector<8xf32>
    %154 = vector.shape_cast %153 : vector<8xf32> to vector<8x1xf32>
    %cst_52 = arith.constant 0.000000e+00 : f32
    %155 = vector.broadcast %cst_52 : f32 to vector<8x1xf32>
    %156 = arith.maximumf %154, %155 : vector<8x1xf32>
    %157 = vector.broadcast %156 : vector<8x1xf32> to vector<8x8xf32>
    %158 = arith.subf %152, %157 : vector<8x8xf32>
    %159 = math.exp %158 : vector<8x8xf32>
    %cst_53 = arith.constant dense<0.000000e+00> : vector<8xf32>
    %160 = vector.multi_reduction <add>, %159, %cst_53 [1] : vector<8x8xf32> to vector<8xf32>
    %161 = vector.shape_cast %160 : vector<8xf32> to vector<8x1xf32>
    %cst_54 = arith.constant 0.000000e+00 : f32
    %162 = vector.broadcast %cst_54 : f32 to vector<8x1xf32>
    %163 = arith.subf %162, %156 : vector<8x1xf32>
    %164 = math.exp %163 : vector<8x1xf32>
    %cst_55 = arith.constant 4.000000e+00 : f32
    %165 = vector.broadcast %cst_55 : f32 to vector<8x1xf32>
    %166 = arith.mulf %165, %164 : vector<8x1xf32>
    %167 = arith.addf %161, %166 : vector<8x1xf32>
    %168 = vector.broadcast %167 : vector<8x1xf32> to vector<8x8xf32>
    %169 = arith.divf %159, %168 : vector<8x8xf32>
    %170 = vector.extract_strided_slice %5 {offsets = [8, 0], sizes = [8, 8], strides = [1, 1]} : vector<16x16xf32> to vector<8x8xf32>
    %cst_56 = arith.constant dense<0.000000e+00> : vector<8x8xf32>
    %171 = tpu.matmul %169, %170, %cst_56 {dimension_numbers = #tpu.dot_dimension_numbers<[1], [0], [0], [1], [0, 0, 1, 1], [], []>} : vector<8x8xf32>, vector<8x8xf32>, vector<8x8xf32> -> vector<8x8xf32>
    %172 = vector.extract_strided_slice %26 {offsets = [0, 0], sizes = [8, 32], strides = [1, 1]} : vector<32x32xf32> to vector<8x32xf32>
    %cst_57 = arith.constant dense<0.000000e+00> : vector<8x32xf32>
    %173 = tpu.matmul %171, %172, %cst_57 {dimension_numbers = #tpu.dot_dimension_numbers<[1], [0], [0], [1], [0, 0, 1, 1], [], []>} : vector<8x8xf32>, vector<8x32xf32>, vector<8x32xf32> -> vector<8x32xf32>
    %174 = arith.addf %145, %173 : vector<8x32xf32>
    %175 = vector.extract_strided_slice %12 {offsets = [8, 4], sizes = [8, 4], strides = [1, 1]} : vector<16x16xf32> to vector<8x4xf32>
    %176 = vector.extract_strided_slice %22 {offsets = [8, 0], sizes = [8, 4], strides = [1, 1]} : vector<16x8xf32> to vector<8x4xf32>
    %cst_58 = arith.constant dense<0.000000e+00> : vector<8x8xf32>
    %177 = tpu.matmul %175, %176, %cst_58 {dimension_numbers = #tpu.dot_dimension_numbers<[1], [1], [0], [0], [0, 0, 1, 0], [], []>} : vector<8x4xf32>, vector<8x4xf32>, vector<8x8xf32> -> vector<8x8xf32>
    %178 = vector.extract_strided_slice %15 {offsets = [8, 4], sizes = [8, 4], strides = [1, 1]} : vector<16x16xf32> to vector<8x4xf32>
    %179 = vector.extract_strided_slice %25 {offsets = [8, 0], sizes = [8, 4], strides = [1, 1]} : vector<16x8xf32> to vector<8x4xf32>
    %cst_59 = arith.constant dense<0.000000e+00> : vector<8x8xf32>
    %180 = tpu.matmul %178, %179, %cst_59 {dimension_numbers = #tpu.dot_dimension_numbers<[1], [1], [0], [0], [0, 0, 1, 0], [], []>} : vector<8x4xf32>, vector<8x4xf32>, vector<8x8xf32> -> vector<8x8xf32>
    %181 = arith.addf %177, %180 : vector<8x8xf32>
    %cst_60 = arith.constant dense<0xFF800000> : vector<8xf32>
    %182 = vector.multi_reduction <maximumf>, %181, %cst_60 [1] : vector<8x8xf32> to vector<8xf32>
    %183 = vector.shape_cast %182 : vector<8xf32> to vector<8x1xf32>
    %cst_61 = arith.constant 0.000000e+00 : f32
    %184 = vector.broadcast %cst_61 : f32 to vector<8x1xf32>
    %185 = arith.maximumf %183, %184 : vector<8x1xf32>
    %186 = vector.broadcast %185 : vector<8x1xf32> to vector<8x8xf32>
    %187 = arith.subf %181, %186 : vector<8x8xf32>
    %188 = math.exp %187 : vector<8x8xf32>
    %cst_62 = arith.constant dense<0.000000e+00> : vector<8xf32>
    %189 = vector.multi_reduction <add>, %188, %cst_62 [1] : vector<8x8xf32> to vector<8xf32>
    %190 = vector.shape_cast %189 : vector<8xf32> to vector<8x1xf32>
    %cst_63 = arith.constant 0.000000e+00 : f32
    %191 = vector.broadcast %cst_63 : f32 to vector<8x1xf32>
    %192 = arith.subf %191, %185 : vector<8x1xf32>
    %193 = math.exp %192 : vector<8x1xf32>
    %cst_64 = arith.constant 4.000000e+00 : f32
    %194 = vector.broadcast %cst_64 : f32 to vector<8x1xf32>
    %195 = arith.mulf %194, %193 : vector<8x1xf32>
    %196 = arith.addf %190, %195 : vector<8x1xf32>
    %197 = vector.broadcast %196 : vector<8x1xf32> to vector<8x8xf32>
    %198 = arith.divf %188, %197 : vector<8x8xf32>
    %199 = vector.extract_strided_slice %5 {offsets = [8, 0], sizes = [8, 8], strides = [1, 1]} : vector<16x16xf32> to vector<8x8xf32>
    %cst_65 = arith.constant dense<0.000000e+00> : vector<8x8xf32>
    %200 = tpu.matmul %198, %199, %cst_65 {dimension_numbers = #tpu.dot_dimension_numbers<[1], [0], [0], [1], [0, 0, 1, 1], [], []>} : vector<8x8xf32>, vector<8x8xf32>, vector<8x8xf32> -> vector<8x8xf32>
    %201 = vector.extract_strided_slice %26 {offsets = [8, 0], sizes = [8, 32], strides = [1, 1]} : vector<32x32xf32> to vector<8x32xf32>
    %cst_66 = arith.constant dense<0.000000e+00> : vector<8x32xf32>
    %202 = tpu.matmul %200, %201, %cst_66 {dimension_numbers = #tpu.dot_dimension_numbers<[1], [0], [0], [1], [0, 0, 1, 1], [], []>} : vector<8x8xf32>, vector<8x32xf32>, vector<8x32xf32> -> vector<8x32xf32>
    %203 = arith.addf %174, %202 : vector<8x32xf32>
    %204 = vector.extract_strided_slice %12 {offsets = [8, 8], sizes = [8, 4], strides = [1, 1]} : vector<16x16xf32> to vector<8x4xf32>
    %205 = vector.extract_strided_slice %22 {offsets = [8, 4], sizes = [8, 4], strides = [1, 1]} : vector<16x8xf32> to vector<8x4xf32>
    %cst_67 = arith.constant dense<0.000000e+00> : vector<8x8xf32>
    %206 = tpu.matmul %204, %205, %cst_67 {dimension_numbers = #tpu.dot_dimension_numbers<[1], [1], [0], [0], [0, 0, 1, 0], [], []>} : vector<8x4xf32>, vector<8x4xf32>, vector<8x8xf32> -> vector<8x8xf32>
    %207 = vector.extract_strided_slice %15 {offsets = [8, 8], sizes = [8, 4], strides = [1, 1]} : vector<16x16xf32> to vector<8x4xf32>
    %208 = vector.extract_strided_slice %25 {offsets = [8, 4], sizes = [8, 4], strides = [1, 1]} : vector<16x8xf32> to vector<8x4xf32>
    %cst_68 = arith.constant dense<0.000000e+00> : vector<8x8xf32>
    %209 = tpu.matmul %207, %208, %cst_68 {dimension_numbers = #tpu.dot_dimension_numbers<[1], [1], [0], [0], [0, 0, 1, 0], [], []>} : vector<8x4xf32>, vector<8x4xf32>, vector<8x8xf32> -> vector<8x8xf32>
    %210 = arith.addf %206, %209 : vector<8x8xf32>
    %cst_69 = arith.constant dense<0xFF800000> : vector<8xf32>
    %211 = vector.multi_reduction <maximumf>, %210, %cst_69 [1] : vector<8x8xf32> to vector<8xf32>
    %212 = vector.shape_cast %211 : vector<8xf32> to vector<8x1xf32>
    %cst_70 = arith.constant 0.000000e+00 : f32
    %213 = vector.broadcast %cst_70 : f32 to vector<8x1xf32>
    %214 = arith.maximumf %212, %213 : vector<8x1xf32>
    %215 = vector.broadcast %214 : vector<8x1xf32> to vector<8x8xf32>
    %216 = arith.subf %210, %215 : vector<8x8xf32>
    %217 = math.exp %216 : vector<8x8xf32>
    %cst_71 = arith.constant dense<0.000000e+00> : vector<8xf32>
    %218 = vector.multi_reduction <add>, %217, %cst_71 [1] : vector<8x8xf32> to vector<8xf32>
    %219 = vector.shape_cast %218 : vector<8xf32> to vector<8x1xf32>
    %cst_72 = arith.constant 0.000000e+00 : f32
    %220 = vector.broadcast %cst_72 : f32 to vector<8x1xf32>
    %221 = arith.subf %220, %214 : vector<8x1xf32>
    %222 = math.exp %221 : vector<8x1xf32>
    %cst_73 = arith.constant 4.000000e+00 : f32
    %223 = vector.broadcast %cst_73 : f32 to vector<8x1xf32>
    %224 = arith.mulf %223, %222 : vector<8x1xf32>
    %225 = arith.addf %219, %224 : vector<8x1xf32>
    %226 = vector.broadcast %225 : vector<8x1xf32> to vector<8x8xf32>
    %227 = arith.divf %217, %226 : vector<8x8xf32>
    %228 = vector.extract_strided_slice %5 {offsets = [8, 8], sizes = [8, 8], strides = [1, 1]} : vector<16x16xf32> to vector<8x8xf32>
    %cst_74 = arith.constant dense<0.000000e+00> : vector<8x8xf32>
    %229 = tpu.matmul %227, %228, %cst_74 {dimension_numbers = #tpu.dot_dimension_numbers<[1], [0], [0], [1], [0, 0, 1, 1], [], []>} : vector<8x8xf32>, vector<8x8xf32>, vector<8x8xf32> -> vector<8x8xf32>
    %230 = vector.extract_strided_slice %26 {offsets = [16, 0], sizes = [8, 32], strides = [1, 1]} : vector<32x32xf32> to vector<8x32xf32>
    %cst_75 = arith.constant dense<0.000000e+00> : vector<8x32xf32>
    %231 = tpu.matmul %229, %230, %cst_75 {dimension_numbers = #tpu.dot_dimension_numbers<[1], [0], [0], [1], [0, 0, 1, 1], [], []>} : vector<8x8xf32>, vector<8x32xf32>, vector<8x32xf32> -> vector<8x32xf32>
    %232 = arith.addf %203, %231 : vector<8x32xf32>
    %233 = vector.extract_strided_slice %12 {offsets = [8, 12], sizes = [8, 4], strides = [1, 1]} : vector<16x16xf32> to vector<8x4xf32>
    %234 = vector.extract_strided_slice %22 {offsets = [8, 4], sizes = [8, 4], strides = [1, 1]} : vector<16x8xf32> to vector<8x4xf32>
    %cst_76 = arith.constant dense<0.000000e+00> : vector<8x8xf32>
    %235 = tpu.matmul %233, %234, %cst_76 {dimension_numbers = #tpu.dot_dimension_numbers<[1], [1], [0], [0], [0, 0, 1, 0], [], []>} : vector<8x4xf32>, vector<8x4xf32>, vector<8x8xf32> -> vector<8x8xf32>
    %236 = vector.extract_strided_slice %15 {offsets = [8, 12], sizes = [8, 4], strides = [1, 1]} : vector<16x16xf32> to vector<8x4xf32>
    %237 = vector.extract_strided_slice %25 {offsets = [8, 4], sizes = [8, 4], strides = [1, 1]} : vector<16x8xf32> to vector<8x4xf32>
    %cst_77 = arith.constant dense<0.000000e+00> : vector<8x8xf32>
    %238 = tpu.matmul %236, %237, %cst_77 {dimension_numbers = #tpu.dot_dimension_numbers<[1], [1], [0], [0], [0, 0, 1, 0], [], []>} : vector<8x4xf32>, vector<8x4xf32>, vector<8x8xf32> -> vector<8x8xf32>
    %239 = arith.addf %235, %238 : vector<8x8xf32>
    %cst_78 = arith.constant dense<0xFF800000> : vector<8xf32>
    %240 = vector.multi_reduction <maximumf>, %239, %cst_78 [1] : vector<8x8xf32> to vector<8xf32>
    %241 = vector.shape_cast %240 : vector<8xf32> to vector<8x1xf32>
    %cst_79 = arith.constant 0.000000e+00 : f32
    %242 = vector.broadcast %cst_79 : f32 to vector<8x1xf32>
    %243 = arith.maximumf %241, %242 : vector<8x1xf32>
    %244 = vector.broadcast %243 : vector<8x1xf32> to vector<8x8xf32>
    %245 = arith.subf %239, %244 : vector<8x8xf32>
    %246 = math.exp %245 : vector<8x8xf32>
    %cst_80 = arith.constant dense<0.000000e+00> : vector<8xf32>
    %247 = vector.multi_reduction <add>, %246, %cst_80 [1] : vector<8x8xf32> to vector<8xf32>
    %248 = vector.shape_cast %247 : vector<8xf32> to vector<8x1xf32>
    %cst_81 = arith.constant 0.000000e+00 : f32
    %249 = vector.broadcast %cst_81 : f32 to vector<8x1xf32>
    %250 = arith.subf %249, %243 : vector<8x1xf32>
    %251 = math.exp %250 : vector<8x1xf32>
    %cst_82 = arith.constant 4.000000e+00 : f32
    %252 = vector.broadcast %cst_82 : f32 to vector<8x1xf32>
    %253 = arith.mulf %252, %251 : vector<8x1xf32>
    %254 = arith.addf %248, %253 : vector<8x1xf32>
    %255 = vector.broadcast %254 : vector<8x1xf32> to vector<8x8xf32>
    %256 = arith.divf %246, %255 : vector<8x8xf32>
    %257 = vector.extract_strided_slice %5 {offsets = [8, 8], sizes = [8, 8], strides = [1, 1]} : vector<16x16xf32> to vector<8x8xf32>
    %cst_83 = arith.constant dense<0.000000e+00> : vector<8x8xf32>
    %258 = tpu.matmul %256, %257, %cst_83 {dimension_numbers = #tpu.dot_dimension_numbers<[1], [0], [0], [1], [0, 0, 1, 1], [], []>} : vector<8x8xf32>, vector<8x8xf32>, vector<8x8xf32> -> vector<8x8xf32>
    %259 = vector.extract_strided_slice %26 {offsets = [24, 0], sizes = [8, 32], strides = [1, 1]} : vector<32x32xf32> to vector<8x32xf32>
    %cst_84 = arith.constant dense<0.000000e+00> : vector<8x32xf32>
    %260 = tpu.matmul %258, %259, %cst_84 {dimension_numbers = #tpu.dot_dimension_numbers<[1], [0], [0], [1], [0, 0, 1, 1], [], []>} : vector<8x8xf32>, vector<8x32xf32>, vector<8x32xf32> -> vector<8x32xf32>
    %261 = arith.addf %232, %260 : vector<8x32xf32>
    %c8 = arith.constant 8 : index
    %c0_85 = arith.constant 0 : index
    %262 = vector.load %arg6[%c8, %c0_85] : memref<16x32xf32, #tpu.memory_space<vmem>>, vector<8x32xf32>
    tpu.vector_store %arg6[%c8, %c0_85], %261 {strides = array<i32>} : memref<16x32xf32, #tpu.memory_space<vmem>>, vector<8x32xf32>,
    return
  }
  func.func @transform_0(%arg0: i32) -> (i32, i32) {
    %c0_i32 = arith.constant 0 : i32
    %c0_i32_0 = arith.constant 0 : i32
    %c0_i32_1 = arith.constant 0 : i32
    return %c0_i32, %c0_i32_0 : i32, i32
  }
  func.func @transform_1(%arg0: i32) -> (i32, i32) {
    %c0_i32 = arith.constant 0 : i32
    %c0_i32_0 = arith.constant 0 : i32
    %c0_i32_1 = arith.constant 0 : i32
    return %c0_i32, %c0_i32_0 : i32, i32
  }
  func.func @transform_2(%arg0: i32) -> (i32, i32) {
    %c0_i32 = arith.constant 0 : i32
    %c0_i32_0 = arith.constant 0 : i32
    %c0_i32_1 = arith.constant 0 : i32
    return %c0_i32, %c0_i32_0 : i32, i32
  }
  func.func @transform_3(%arg0: i32) -> (i32, i32) {
    %c0_i32 = arith.constant 0 : i32
    %c0_i32_0 = arith.constant 0 : i32
    %c0_i32_1 = arith.constant 0 : i32
    return %c0_i32, %c0_i32_0 : i32, i32
  }
  func.func @transform_4(%arg0: i32) -> (i32, i32) {
    %c0_i32 = arith.constant 0 : i32
    %c0_i32_0 = arith.constant 0 : i32
    %c0_i32_1 = arith.constant 0 : i32
    return %c0_i32, %c0_i32_0 : i32, i32
  }
  func.func @transform_5(%arg0: i32) -> (i32, i32) {
    %c0_i32 = arith.constant 0 : i32
    %c0_i32_0 = arith.constant 0 : i32
    %c0_i32_1 = arith.constant 0 : i32
    return %c0_i32, %c0_i32_0 : i32, i32
  }
}

</mosaic_0001>

<bundles_post_ra>
// kernel: tpu_custom_call.1
= control target key start
LH: loop header
LB: loop body
LE: loop exit
PB: predicated region body
PF: predicated region fallthrough
CT: control target
= control target key end

     0   :  { %10 = vsyncpa [#allocation3], 0  ;;  %s3728_s0 = inlined_call_operand.hbm [shape: f32[16,32], index: 0, kind: input, shape index: {}]   ;;  %s3729_s1 = inlined_call_operand.hbm [shape: f32[32,64], index: 1, kind: input, shape index: {}]   ;;  %s3730_s2 = inlined_call_operand.hbm [shape: f32[32,32], index: 2, kind: input, shape index: {}]   ;;  %s3731_s3 = inlined_call_operand.hbm [shape: f32[16,16], index: 3, kind: input, shape index: {}]   ;;  %s3732_s4 = inlined_call_operand.hbm [shape: f32[16,16], index: 4, kind: input, shape index: {}]   ;;  %s3733_s5 = inlined_call_operand.hbm [shape: f32[16,32], index: 5, kind: output, shape index: {}]  }
   0x1   :  { %11 = vsyncpa [#allocation6], 0 }
   0x2   :  { %12 = vsyncpa [#allocation9], 0 }
   0x3   :  { %13 = vsyncpa [#allocation4], 0  ;;  %s3330_s18 = smov [#allocation5]   ;;  %s3331_s20 = smov [#allocation8]  }
   0x4   :  { %s31_s19 = sshll.u32 %s3330_s18, 4  ;;  %s55_s21 = sshll.u32 %s3331_s20, 4  ;;  %s32_s19 = int_to_ptr.vmem [resolvable:$true] %s31_s19  ;;  %s56_s21 = int_to_ptr.vmem [resolvable:$true] %s55_s21 }
   0x5   :  { %s3210_s22 = scalar_lea.vmem %s32_s19, 512  ;;  %p3215_p1 = scmp.lt.s32.totalorder %s32_s19, %s32_s19 }
   0x6   :  { %p3211_p0 = scmp.ne.s32.totalorder %s32_s19, %s3210_s22  ;;  %p3216_p2 = scmp.lt.s32.totalorder %s3210_s22, %s3210_s22 }
   0x8   :  { %p3217_p3 = por %p3216_p2, %p3215_p1 }
   0xa   :  { %p3218_p4 = pnand %p3217_p3, %p3211_p0 }
   0xc   :  { %3221 = shalt.err (!%p3218_p4)
}
   0xd   :  { %s3332_s23 = smov 128   ;;  %s3333_s24 = smov 8  }
   0xe   :  { %37 = dma.hbm_to_vmem [thread:$0]  %s3729_s1, 512, %s32_s19, [#allocation6], %s3332_s23, %s3332_s23, %s3333_s24  }
   0xf   :  { %s3230_s27 = scalar_lea.vmem %s56_s21, 256  ;;  %p3235_p6 = scmp.lt.s32.totalorder %s56_s21, %s56_s21 }
  0x10   :  { %p3231_p5 = scmp.ne.s32.totalorder %s56_s21, %s3230_s27  ;;  %p3236_p7 = scmp.lt.s32.totalorder %s3230_s27, %s3230_s27 }
  0x12   :  { %p3237_p8 = por %p3236_p7, %p3235_p6 }
  0x14   :  { %p3238_p9 = pnand %p3237_p8, %p3231_p5 }
  0x16   :  { %3241 = shalt.err (!%p3238_p9)
}
  0x17   :  { %61 = dma.hbm_to_vmem [thread:$0]  %s3731_s3, 256, %s56_s21, [#allocation9], %s3332_s23, %s3332_s23, %s3333_s24  }
  0x18   :  { %s3334_s30 = smov [#allocation2]   ;;  %s3335_s7 = smov [#allocation7]  }
  0x19   :  { %s19_s6 = sshll.u32 %s3334_s30, 4  ;;  %s43_s8 = sshll.u32 %s3335_s7, 4  ;;  %s20_s6 = int_to_ptr.vmem [resolvable:$true] %s19_s6  ;;  %s44_s8 = int_to_ptr.vmem [resolvable:$true] %s43_s8 }
  0x1a   :  { %s3250_s1 = scalar_lea.vmem %s20_s6, 256  ;;  %p3255_p11 = scmp.lt.s32.totalorder %s20_s6, %s20_s6 }
  0x1b   :  { %p3251_p10 = scmp.ne.s32.totalorder %s20_s6, %s3250_s1  ;;  %p3256_p12 = scmp.lt.s32.totalorder %s3250_s1, %s3250_s1 }
  0x1d   :  { %p3257_p13 = por %p3256_p12, %p3255_p11 }
  0x1f   :  { %p3258_p0 = pnand %p3257_p13, %p3251_p10 }
  0x21   :  { %3261 = shalt.err (!%p3258_p0)
}
  0x22   :  { %25 = dma.hbm_to_vmem [thread:$0]  %s3728_s0, 256, %s20_s6, [#allocation3], %s3332_s23, %s3332_s23, %s3333_s24  }
  0x23   :  { %s3270_s3 = scalar_lea.vmem %s44_s8, 512  ;;  %p3275_p2 = scmp.lt.s32.totalorder %s44_s8, %s44_s8 }
  0x24   :  { %p3271_p1 = scmp.ne.s32.totalorder %s44_s8, %s3270_s3  ;;  %p3276_p3 = scmp.lt.s32.totalorder %s3270_s3, %s3270_s3 }
  0x26   :  { %p3277_p4 = por %p3276_p3, %p3275_p2 }
  0x28   :  { %p3278_p5 = pnand %p3277_p4, %p3271_p1 }
  0x2a   :  { %3281 = shalt.err (!%p3278_p5)
}
  0x2b   :  { %49 = dma.hbm_to_vmem [thread:$0]  %s3730_s2, 512, %s44_s8, [#allocation6], %s3332_s23, %s3332_s23, %s3333_s24  }
  0x2c   :  { %s3336_s13 = smov [#allocation10]  }
  0x2d   :  { %s67_s14 = sshll.u32 %s3336_s13, 4  ;;  %s68_s14 = int_to_ptr.vmem [resolvable:$true] %s67_s14 }
  0x2e   :  { %s3290_s15 = scalar_lea.vmem %s68_s14, 256  ;;  %p3295_p7 = scmp.lt.s32.totalorder %s68_s14, %s68_s14 }
  0x2f   :  { %p3291_p6 = scmp.ne.s32.totalorder %s68_s14, %s3290_s15  ;;  %p3296_p8 = scmp.lt.s32.totalorder %s3290_s15, %s3290_s15 }
  0x31   :  { %p3297_p9 = por %p3296_p8, %p3295_p7 }
  0x33   :  { %p3298_p10 = pnand %p3297_p9, %p3291_p6 }
  0x35   :  { %3301 = shalt.err (!%p3298_p10)
}
  0x36   :  { %73 = dma.hbm_to_vmem [thread:$0]  %s3732_s4, 256, %s68_s14, [#allocation9], %s3332_s23, %s3332_s23, %s3333_s24  }
  0x37   :  { %3322 = dma.done.wait [#allocation3], 256  }
  0x38   :  { %3323 = vsyncadd [#allocation3], 4294967040 }
  0x39   :  { %3324 = dma.done.wait [#allocation6], 1024  }
  0x3a   :  { %3325 = vsyncadd [#allocation6], 4294966272 }
  0x3b   :  { %3326 = dma.done.wait [#allocation9], 512  }
  0x3c   :  { %3327 = vsyncadd [#allocation9], 4294966784  ;;  %vm95_vm0 = vcmask 261120   ;;  %v94_v0 = vld [vmem:[#allocation5 + $0x18] sm:$0xff]  ;;  %v93_v1 = vld [vmem:[#allocation5 + $0x10] sm:$0xff]  ;;  %s3337_s2 = smov 40  }
  0x3d   :  { %2962 = vmatprep.subr.mxu0 %v94_v0  ;;  %v89_v2 = vld [vmem:[#allocation2] sm:$0xff]  ;;  %v92_v3 = vld [vmem:[#allocation5 + $0x8] sm:$0xff]  ;;  %v3412_v4 = vld [vmem:[#allocation8] sm:$0xff]  ;;  %s3338_s4 = smov 32   ;;  %s3339_s17 = smov 16   ;;  %v3341_v14 = vmov 0.0  }
  0x3e   :  { %2963 = vmatpush3.msra.mxu0 %v94_v0  ;;  %2970 = vmatprep.mubr.msk.f32.mxu0 %vm95_vm0, %v89_v2  ;;  %v179_v5 = vld [vmem:[#allocation10] sm:$0xff]  ;;  %v91_v6 = vld [vmem:[#allocation5] sm:$0xff]  ;;  %v90_v7 = vld [vmem:[#allocation2 + $0x8] sm:$0xff]  ;;  %s3340_s18 = smov 120   ;;  %s3342_s19 = smov 112   ;;  %vm3343_vm1 = vmmov 0  }
  0x3f   :  { %2964 = vmatprep.subr.mxu0 %v93_v1  ;;  %259 = vrot.lane.b32.xlu0 %v3412_v4, %s3337_s2  ;;  %s3344_s20 = smov 96   ;;  %vm284_vm2 = vcmask 31744   ;;  %vm438_vm3 = vcmask 64512   ;;  %s3345_s21 = smov 80  }
  0x40   :  { %2965 = vmatpush3.msra.mxu0 %v93_v1  ;;  %251 = vrot.lane.b32.xlu1 %v179_v5, %s3338_s4  ;;  %s3346_s22 = smov 124   ;;  %s3347_s25 = smov 92  }
  0x41   :  { %2966 = vmatprep.subr.mxu0 %v92_v3  ;;  %2973 = vmatprep.subr.mxu1 %v3341_v14  ;;  %s3348_s26 = smov 116   ;;  %s3349_s27 = smov 72  }
  0x42   :  { %2967 = vmatpush3.msra.mxu0 %v92_v3  ;;  %2975 = vmatprep.mubr.msk.f32.mxu1 %vm3343_vm1, %v3341_v14  ;;  %s3350_s28 = smov [#allocation11]  }
  0x43   :  { %2968 = vmatprep.subr.mxu0 %v91_v6  ;;  %233 = vrot.lane.b32.xlu0 %v179_v5, %s3337_s2  ;;  %s2828_s29 = sshll.u32 %s3350_s28, 4  ;;  %s2829_s29 = int_to_ptr.vmem [resolvable:$true] %s2828_s29 }
  0x44   :  { %2969 = vmatpush3.msra.mxu0 %v91_v6  ;;  %s3302_s30 = scalar_lea.vmem %s2829_s29, 256  ;;  %p3307_p12 = scmp.lt.s32.totalorder %s2829_s29, %s2829_s29 }
  0x45   :  { %2971 = vmatmul.mubr.msk.f32.vlgmr.msra.gmra.mxu0 %vm95_vm0, %v90_v7  ;;  %2983 = vmatprep.subr.mxu0 %v3341_v14  ;;  %p3303_p11 = scmp.ne.s32.totalorder %s2829_s29, %s3302_s30  ;;  %p3308_p13 = scmp.lt.s32.totalorder %s3302_s30, %s3302_s30 }
  0x46   :  { %2985 = vmatprep.mubr.msk.f32.mxu0 %vm3343_vm1, %v3341_v14 }
  0x47   :  { %207 = vrot.lane.b32.xlu0 %v3412_v4, %s3339_s17  ;;  %p3309_p0 = por %p3308_p13, %p3307_p12 }
  0x49   :  { %p3310_p1 = pnand %p3309_p0, %p3303_p11 }
  0xb1   :  { %v260_v8 = vpop.permute.xlu0 %259 }
  0xb2   :  { %v252_v17 = vpop.permute.xlu1 %251 }
  0xb5   :  { %v234_v10 = vpop.permute.xlu0 %233 }
  0xb9   :  { %v208_v15 = vpop.permute.xlu0 %207 }
 0x105   :  { %v3421_v9 = vpop.f32.mrf.mxu0 }
 0x107   :  { %v3423_v11 = vpop.f32.mrf.mxu0 }
 0x108   :  { %v265_v12 = vmul.f32 %v260_v8, %v3423_v11  ;;  %v239_v13 = vmul.f32 %v234_v10, %v3423_v11  ;;  %v213_v16 = vmul.f32 %v208_v15, %v3423_v11  ;;  %v257_v18 = vmul.f32 %v252_v17, %v3423_v11  ;;  %v3504_v8 = vld [vmem:[#allocation7 + $0x8] sm:$0xff] }
 0x109   :  { %v203_v28 = vmul.f32 %v179_v5, %v3423_v11  ;;  %v181_v32 = vmul.f32 %v3412_v4, %v3423_v11 }
 0x10a   :  { %269 = vrot.lane.b32.xlu1 %v265_v12, %s3340_s18  ;;  %243 = vrot.lane.b32.xlu0 %v239_v13, %s3340_s18 }
 0x10e   :  { %225 = vrot.lane.b32.xlu1 %v3412_v4, %s3338_s4 }
 0x112   :  { %185 = vrot.lane.b32.xlu1 %v179_v5, %s3339_s17 }
 0x116   :  { %217 = vrot.lane.b32.xlu1 %v213_v16, %s3342_s19 }
 0x17c   :  { %v270_v19 = vpop.permute.xlu1 %269  ;;  %v244_v23 = vpop.permute.xlu0 %243 }
 0x17d   :  { %v3441_v20 = vadd.f32 %v270_v19, %v257_v18 }
 0x17f   :  { %282 = vrot.lane.b32.xlu0 %v3441_v20, %s3344_s20 }
 0x180   :  { %v226_v21 = vpop.permute.xlu1 %225 }
 0x181   :  { %v231_v22 = vmul.f32 %v226_v21, %v3423_v11 }
 0x183   :  { %v3446_v24 = vsub.f32 %v231_v22, %v244_v23 }
 0x184   :  { %v186_v25 = vpop.permute.xlu1 %185 }
 0x185   :  { %v191_v26 = vmul.f32 %v186_v25, %v3423_v11  ;;  %361 = vrot.lane.b32.xlu0 %v3446_v24, %s3344_s20 }
 0x187   :  { %195 = vrot.lane.b32.xlu1 %v191_v26, %s3342_s19 }
 0x188   :  { %v218_v27 = vpop.permute.xlu1 %217 }
 0x189   :  { %v3454_v30 = vadd.f32 %v218_v27, %v203_v28 }
 0x1f1   :  { %v283_v29 = vpop.permute.xlu0 %282 }
 0x1f2   :  { %2974 = vmatpush3.xpose.msk.msra.mxu1 %vm284_vm2, %v283_v29 }
 0x1f3   :  { %2978 = vmatprep.subr.mxu1 %v3341_v14 }
 0x1f5   :  { %2976 = vmatmul.mubr.msk.f32.vlgmr.msra.gmra.mxu1 %vm284_vm2, %v3454_v30 }
 0x1f6   :  { %2980 = vmatprep.mubr.msk.f32.mxu1 %vm3343_vm1, %v3341_v14 }
 0x1f7   :  { %v362_v31 = vpop.permute.xlu0 %361 }
 0x1f8   :  { %2979 = vmatpush3.xpose.msk.msra.mxu1 %vm284_vm2, %v362_v31 }
 0x1f9   :  { %v196_v33 = vpop.permute.xlu1 %195  ;;  %2988 = vmatprep.subr.mxu1 %v3341_v14 }
 0x1fa   :  { %v3465_v34 = vsub.f32 %v181_v32, %v196_v33 }
 0x1fc   :  { %2981 = vmatmul.mubr.msk.f32.vlgmr.msra.gmra.mxu1 %vm284_vm2, %v3465_v34 }
 0x1fd   :  { %2989 = vmatpush3.xpose.msk.msra.mxu1 %vm284_vm2, %v283_v29  ;;  %2990 = vmatprep.mubr.msk.f32.mxu1 %vm3343_vm1, %v3341_v14 }
 0x1fe   :  { %2998 = vmatprep.subr.mxu1 %v3341_v14 }
 0x2b5   :  { %v356_v35 = vpop.f32.mrf.mxu1 }
 0x2b7   :  { %v2977_v36 = vpop.f32.mrf.mxu1 }
 0x2bc   :  { %v434_v37 = vpop.f32.mrf.mxu1 }
 0x2bd   :  { %v435_v38 = vadd.f32 %v434_v37, %v356_v35 }
 0x2be   :  { %v2982_v39 = vpop.f32.mrf.mxu1 }
 0x2bf   :  { %v439_v40 = vsel %vm438_vm3, %v435_v38, -inf }
 0x2c0   :  { %440 = vmax.xlane.f32.xlu0 %v439_v40 }
 0x2d6   :  { %457 = vrot.lane.b32.xlu0 %v3423_v11, %s3345_s21 }
 0x2da   :  { %607 = vrot.lane.b32.xlu0 %v3465_v34, %s3346_s22 }
 0x349   :  { %v441_v41 = vpop.xlane.xlu0 %440 }
 0x34a   :  { %v442_v42 = vmax.f32 %v441_v41, 0.0 }
 0x34c   :  { %v443_v43 = vsub.f32 %v435_v38, %v442_v42  ;;  %v449_v48 = vsub.f32 0.0, %v442_v42 }
 0x34d   :  { %v458_v44 = vpop.permute.xlu0 %457 }
 0x34e   :  { %v444_v45 = vmul.f32 1.442695, %v443_v43  ;;  %2984 = vmatpush3.msra.mxu0 %v458_v44  ;;  %v450_v49 = vmul.f32 1.442695, %v449_v48 }
 0x34f   :  { %2993 = vmatprep.subr.mxu0 %v3341_v14 }
 0x350   :  { %3154 = vpow2.f32 %v444_v45  ;;  %v3542_v45 = vld [vmem:[#allocation7 + $0x10] sm:$0xff] }
 0x351   :  { %3156 = vpow2.f32 %v450_v49  ;;  %v608_v57 = vpop.permute.xlu0 %607 }
 0x35d   :  { %v3155_v46 = vpop.eup %3154 }
 0x35e   :  { %v446_v47 = vsel %vm438_vm3, %v3155_v46, 0.0  ;;  %v3157_v50 = vpop.eup %3156 }
 0x35f   :  { %447 = vadd.xlane.f32.xlu1 %v446_v47  ;;  %v452_v51 = vmul.f32 4.0, %v3157_v50 }
 0x370   :  { %533 = vrot.lane.b32.xlu1 %v3454_v30, %s3346_s22 }
 0x3e8   :  { %v448_v52 = vpop.xlane.xlu1 %447 }
 0x3e9   :  { %v453_v53 = vadd.f32 %v452_v51, %v448_v52 }
 0x3eb   :  { %3158 = vrcp.f32 %v453_v53 }
 0x3ec   :  { %v534_v54 = vpop.permute.xlu1 %533 }
 0x3ed   :  { %2991 = vmatmul.mubr.msk.f32.vlgmr.msra.gmra.mxu1 %vm284_vm2, %v534_v54 }
 0x3ee   :  { %2999 = vmatpush3.msra.mxu1 %v458_v44  ;;  %3000 = vmatprep.mubr.msk.f32.mxu1 %vm3343_vm1, %v3341_v14 }
 0x3ef   :  { %3008 = vmatprep.subr.mxu1 %v3341_v14 }
 0x3f8   :  { %v3159_v55 = vpop.eup %3158 }
 0x3f9   :  { %v455_v56 = vmul.f32 %v3159_v55, %v3155_v46 }
 0x3fb   :  { %2986 = vmatmul.mubr.msk.f32.vlgmr.msra.gmra.mxu0 %vm438_vm3, %v455_v56 }
 0x3fc   :  { %2994 = vmatpush3.xpose.msk.msra.mxu0 %vm284_vm2, %v362_v31  ;;  %2995 = vmatprep.mubr.msk.f32.mxu0 %vm3343_vm1, %v3341_v14 }
 0x3fd   :  { %3003 = vmatprep.subr.mxu0 %v3341_v14 }
 0x3ff   :  { %2996 = vmatmul.mubr.msk.f32.vlgmr.msra.gmra.mxu0 %vm284_vm2, %v608_v57 }
 0x400   :  { %3005 = vmatprep.mubr.msk.f32.mxu0 %vm3343_vm1, %v3341_v14  ;;  %3004 = vmatpush3.msra.mxu0 %v3504_v8 }
 0x401   :  { %3013 = vmatprep.subr.mxu0 %v3341_v14 }
 0x4ad   :  { %v603_v58 = vpop.f32.mrf.mxu1 }
 0x4af   :  { %v2992_v59 = vpop.f32.mrf.mxu1 }
 0x4bb   :  { %v529_v60 = vpop.f32.mrf.mxu0 }
 0x4bd   :  { %v2987_v61 = vpop.f32.mrf.mxu0 }
 0x4bf   :  { %v677_v62 = vpop.f32.mrf.mxu0 }
 0x4c0   :  { %v678_v63 = vadd.f32 %v677_v62, %v603_v58 }
 0x4c1   :  { %v2997_v0 = vpop.f32.mrf.mxu0 }
 0x4c2   :  { %v681_v1 = vsel %vm438_vm3, %v678_v63, -inf }
 0x4c3   :  { %682 = vmax.xlane.f32.xlu1 %v681_v1 }
 0x4d4   :  { %997 = vrot.lane.b32.xlu1 %v3446_v24, %s3347_s25 }
 0x4d8   :  { %917 = vrot.lane.b32.xlu1 %v3454_v30, %s3340_s18 }
 0x54c   :  { %v683_v2 = vpop.xlane.xlu1 %682 }
 0x54d   :  { %v684_v3 = vmax.f32 %v683_v2, 0.0  ;;  %v3568_v2 = vld [vmem:[#allocation10 + $0x8] sm:$0xff] }
 0x54f   :  { %v685_v4 = vsub.f32 %v678_v63, %v684_v3  ;;  %v691_v10 = vsub.f32 0.0, %v684_v3  ;;  %v178_v3 = vld [vmem:[#allocation8 + $0x8] sm:$0xff] }
 0x550   :  { %v3515_v22 = vpop.permute.xlu1 %997 }
 0x551   :  { %v686_v5 = vmul.f32 1.442695, %v685_v4  ;;  %v692_v12 = vmul.f32 1.442695, %v691_v10 }
 0x553   :  { %3160 = vpow2.f32 %v686_v5 }
 0x554   :  { %3162 = vpow2.f32 %v692_v12  ;;  %v918_v26 = vpop.permute.xlu1 %917 }
 0x560   :  { %v3161_v6 = vpop.eup %3160 }
 0x561   :  { %v688_v7 = vsel %vm438_vm3, %v3161_v6, 0.0  ;;  %v3163_v13 = vpop.eup %3162 }
 0x562   :  { %689 = vadd.xlane.f32.xlu0 %v688_v7  ;;  %v694_v15 = vmul.f32 4.0, %v3163_v13 }
 0x578   :  { %919 = vrot.lane.b32.xlu0 %v3441_v20, %s3347_s25  ;;  %v3508_v20 = vld [vmem:[#allocation7] sm:$0xff] }
 0x57c   :  { %995 = vrot.lane.b32.xlu0 %v3465_v34, %s3340_s18 }
 0x5eb   :  { %v690_v16 = vpop.xlane.xlu0 %689 }
 0x5ec   :  { %v695_v17 = vadd.f32 %v694_v15, %v690_v16 }
 0x5ee   :  { %3164 = vrcp.f32 %v695_v17 }
 0x5ef   :  { %v920_v21 = vpop.permute.xlu0 %919 }
 0x5f3   :  { %v996_v23 = vpop.permute.xlu0 %995 }
 0x5fb   :  { %v3165_v18 = vpop.eup %3164 }
 0x5fc   :  { %v697_v19 = vmul.f32 %v3165_v18, %v3161_v6 }
 0x5fe   :  { %3001 = vmatmul.mubr.msk.f32.vlgmr.msra.gmra.mxu1 %vm438_vm3, %v697_v19 }
 0x5ff   :  { %3009 = vmatpush3.msra.mxu1 %v3508_v20  ;;  %3010 = vmatprep.mubr.msk.f32.mxu1 %vm3343_vm1, %v3341_v14 }
 0x600   :  { %3018 = vmatprep.subr.mxu1 %v3341_v14 }
 0x602   :  { %3011 = vmatmul.mubr.msk.f32.vlgmr.msra.gmra.mxu1 %vm438_vm3, %v529_v60 }
 0x603   :  { %3019 = vmatpush3.xpose.msk.msra.mxu1 %vm284_vm2, %v3515_v22  ;;  %3020 = vmatprep.mubr.msk.f32.mxu1 %vm3343_vm1, %v3341_v14 }
 0x604   :  { %3028 = vmatprep.subr.mxu1 %v3341_v14 }
 0x606   :  { %3021 = vmatmul.mubr.msk.f32.vlgmr.msra.gmra.mxu1 %vm284_vm2, %v996_v23  ;;  %v3581_v23 = vld [vmem:[#allocation7 + $0x18] sm:$0xff] }
 0x607   :  { %3030 = vmatprep.mubr.msk.f32.mxu1 %vm3343_vm1, %v3341_v14  ;;  %3029 = vmatpush3.msra.mxu1 %v3542_v45 }
 0x608   :  { %3038 = vmatprep.subr.mxu1 %v3341_v14 }
 0x6be   :  { %v767_v24 = vpop.f32.mrf.mxu1 }
 0x6bf   :  { %3006 = vmatmul.mubr.msk.f32.vlgmr.msra.gmra.mxu0 %vm438_vm3, %v767_v24 }
 0x6c0   :  { %3014 = vmatpush3.xpose.msk.msra.mxu0 %vm284_vm2, %v920_v21  ;;  %v3002_v25 = vpop.f32.mrf.mxu1  ;;  %3015 = vmatprep.mubr.msk.f32.mxu0 %vm3343_vm1, %v3341_v14 }
 0x6c1   :  { %3023 = vmatprep.subr.mxu0 %v3341_v14 }
 0x6c2   :  { %v913_v27 = vpop.f32.mrf.mxu1 }
 0x6c3   :  { %3016 = vmatmul.mubr.msk.f32.vlgmr.msra.gmra.mxu0 %vm284_vm2, %v918_v26 }
 0x6c4   :  { %v3012_v28 = vpop.f32.mrf.mxu1  ;;  %3025 = vmatprep.mubr.msk.f32.mxu0 %vm3343_vm1, %v3341_v14 }
 0x6c6   :  { %v1069_v29 = vpop.f32.mrf.mxu1 }
 0x6c8   :  { %v3022_v31 = vpop.f32.mrf.mxu1 }
 0x77f   :  { %v840_v32 = vpop.f32.mrf.mxu0 }
 0x780   :  { %v914_v58 = vadd.f32 %v913_v27, %v840_v32 }
 0x781   :  { %v3007_v33 = vpop.f32.mrf.mxu0 }
 0x783   :  { %v991_v35 = vpop.f32.mrf.mxu0 }
 0x784   :  { %v1070_v36 = vadd.f32 %v1069_v29, %v991_v35 }
 0x785   :  { %v3017_v37 = vpop.f32.mrf.mxu0 }
 0x786   :  { %v1073_v38 = vsel %vm438_vm3, %v1070_v36, -inf }
 0x787   :  { %1074 = vmax.xlane.f32.xlu1 %v1073_v38 }
 0x798   :  { %1240 = vrot.lane.b32.xlu1 %v3454_v30, %s3348_s26 }
 0x79c   :  { %1314 = vrot.lane.b32.xlu1 %v3465_v34, %s3348_s26 }
 0x810   :  { %v1075_v39 = vpop.xlane.xlu1 %1074 }
 0x811   :  { %v1076_v40 = vmax.f32 %v1075_v39, 0.0 }
 0x813   :  { %v1077_v41 = vsub.f32 %v1070_v36, %v1076_v40  ;;  %v1083_v30 = vsub.f32 0.0, %v1076_v40 }
 0x814   :  { %v1241_v52 = vpop.permute.xlu1 %1240 }
 0x815   :  { %v1078_v42 = vmul.f32 1.442695, %v1077_v41  ;;  %v1084_v34 = vmul.f32 1.442695, %v1083_v30 }
 0x817   :  { %3166 = vpow2.f32 %v1078_v42 }
 0x818   :  { %3168 = vpow2.f32 %v1084_v34  ;;  %v1315_v55 = vpop.permute.xlu1 %1314  ;;  %v204_v34 = vmul.f32 %v3421_v9, %v3568_v2 }
 0x824   :  { %v3167_v43 = vpop.eup %3166 }
 0x825   :  { %v1080_v44 = vsel %vm438_vm3, %v3167_v43, 0.0  ;;  %v3169_v46 = vpop.eup %3168 }
 0x826   :  { %1081 = vadd.xlane.f32.xlu0 %v1080_v44  ;;  %v1086_v47 = vmul.f32 4.0, %v3169_v46  ;;  %v182_v46 = vmul.f32 %v3421_v9, %v178_v3 }
 0x83c   :  { %1090 = vrot.lane.b32.xlu0 %v3423_v11, %s3349_s27 }
 0x8af   :  { %v1082_v48 = vpop.xlane.xlu0 %1081 }
 0x8b0   :  { %v1087_v49 = vadd.f32 %v1086_v47, %v1082_v48 }
 0x8b2   :  { %3170 = vrcp.f32 %v1087_v49 }
 0x8b3   :  { %v1091_v50 = vpop.permute.xlu0 %1090 }
 0x8b4   :  { %3024 = vmatpush3.msra.mxu0 %v1091_v50 }
 0x8b5   :  { %3033 = vmatprep.subr.mxu0 %v3341_v14 }
 0x8bf   :  { %v3171_v51 = vpop.eup %3170 }
 0x8c0   :  { %v1089_v11 = vmul.f32 %v3171_v51, %v3167_v43 }
 0x8c2   :  { %3026 = vmatmul.mubr.msk.f32.vlgmr.msra.gmra.mxu0 %vm438_vm3, %v1089_v11 }
 0x8c3   :  { %3034 = vmatpush3.xpose.msk.msra.mxu0 %vm284_vm2, %v920_v21  ;;  %3035 = vmatprep.mubr.msk.f32.mxu0 %vm3343_vm1, %v3341_v14 }
 0x8c4   :  { %3043 = vmatprep.subr.mxu0 %v3341_v14 }
 0x8c6   :  { %3036 = vmatmul.mubr.msk.f32.vlgmr.msra.gmra.mxu0 %vm284_vm2, %v1241_v52 }
 0x8c7   :  { %3044 = vmatpush3.msra.mxu0 %v1091_v50  ;;  %3045 = vmatprep.mubr.msk.f32.mxu0 %vm3343_vm1, %v3341_v14 }
 0x8c8   :  { %3053 = vmatprep.subr.mxu0 %v3341_v14 }
 0x982   :  { %v1162_v53 = vpop.f32.mrf.mxu0 }
 0x983   :  { %3031 = vmatmul.mubr.msk.f32.vlgmr.msra.gmra.mxu1 %vm438_vm3, %v1162_v53 }
 0x984   :  { %3039 = vmatpush3.xpose.msk.msra.mxu1 %vm284_vm2, %v3515_v22  ;;  %v3027_v54 = vpop.f32.mrf.mxu0  ;;  %3040 = vmatprep.mubr.msk.f32.mxu1 %vm3343_vm1, %v3341_v14 }
 0x985   :  { %3048 = vmatprep.subr.mxu1 %v3341_v14 }
 0x986   :  { %v1310_v56 = vpop.f32.mrf.mxu0 }
 0x987   :  { %3041 = vmatmul.mubr.msk.f32.vlgmr.msra.gmra.mxu1 %vm284_vm2, %v1315_v55 }
 0x988   :  { %v3037_v57 = vpop.f32.mrf.mxu0  ;;  %3050 = vmatprep.mubr.msk.f32.mxu1 %vm3343_vm1, %v3341_v14  ;;  %3049 = vmatpush3.msra.mxu1 %v3581_v23 }
 0x989   :  { %3058 = vmatprep.subr.mxu1 %v3341_v14 }
 0xa43   :  { %v1235_v59 = vpop.f32.mrf.mxu1 }
 0xa44   :  { %v3565_v60 = vadd.f32 %v1235_v59, %v914_v58 }
 0xa45   :  { %v3032_v61 = vpop.f32.mrf.mxu1 }
 0xa47   :  { %v1384_v62 = vpop.f32.mrf.mxu1 }
 0xa48   :  { %v1385_v63 = vadd.f32 %v1384_v62, %v1310_v56 }
 0xa49   :  { %v3042_v0 = vpop.f32.mrf.mxu1 }
 0xa4a   :  { %v1388_v1 = vsel %vm438_vm3, %v1385_v63, -inf }
 0xa4b   :  { %1389 = vmax.xlane.f32.xlu0 %v1388_v1 }
 0xa61   :  { %235 = vrot.lane.b32.xlu0 %v3568_v2, %s3337_s2 }
 0xa65   :  { %227 = vrot.lane.b32.xlu0 %v178_v3, %s3338_s4 }
 0xad4   :  { %v1390_v4 = vpop.xlane.xlu0 %1389 }
 0xad5   :  { %v1391_v5 = vmax.f32 %v1390_v4, 0.0 }
 0xad7   :  { %v1392_v6 = vsub.f32 %v1385_v63, %v1391_v5  ;;  %v1398_v16 = vsub.f32 0.0, %v1391_v5 }
 0xad8   :  { %v236_v7 = vpop.permute.xlu0 %235 }
 0xad9   :  { %v1393_v10 = vmul.f32 1.442695, %v1392_v6  ;;  %v240_v12 = vmul.f32 %v3421_v9, %v236_v7  ;;  %v1399_v17 = vmul.f32 1.442695, %v1398_v16 }
 0xadb   :  { %3172 = vpow2.f32 %v1393_v10  ;;  %245 = vrot.lane.b32.xlu0 %v240_v12, %s3340_s18 }
 0xadc   :  { %3174 = vpow2.f32 %v1399_v17  ;;  %v228_v26 = vpop.permute.xlu0 %227 }
 0xadd   :  { %v232_v28 = vmul.f32 %v3421_v9, %v228_v26 }
 0xadf   :  { %187 = vrot.lane.b32.xlu0 %v3568_v2, %s3339_s17 }
 0xae8   :  { %v3173_v13 = vpop.eup %3172 }
 0xae9   :  { %v1395_v15 = vsel %vm438_vm3, %v3173_v13, 0.0  ;;  %v3175_v18 = vpop.eup %3174 }
 0xaea   :  { %1396 = vadd.xlane.f32.xlu1 %v1395_v15  ;;  %v1401_v19 = vmul.f32 4.0, %v3175_v18 }
 0xafb   :  { %261 = vrot.lane.b32.xlu1 %v178_v3, %s3337_s2 }
 0xaff   :  { %253 = vrot.lane.b32.xlu1 %v3568_v2, %s3338_s4 }
 0xb4d   :  { %v246_v27 = vpop.permute.xlu0 %245 }
 0xb4e   :  { %v3589_v29 = vsub.f32 %v232_v28, %v246_v27 }
 0xb51   :  { %v188_v38 = vpop.permute.xlu0 %187 }
 0xb52   :  { %v192_v40 = vmul.f32 %v3421_v9, %v188_v38 }
 0xb73   :  { %v1397_v21 = vpop.xlane.xlu1 %1396 }
 0xb74   :  { %v1402_v22 = vadd.f32 %v1401_v19, %v1397_v21 }
 0xb76   :  { %3176 = vrcp.f32 %v1402_v22 }
 0xb77   :  { %v262_v24 = vpop.permute.xlu1 %261 }
 0xb78   :  { %v266_v25 = vmul.f32 %v3421_v9, %v262_v24 }
 0xb7a   :  { %271 = vrot.lane.b32.xlu1 %v266_v25, %s3340_s18 }
 0xb7b   :  { %v254_v33 = vpop.permute.xlu1 %253 }
 0xb7c   :  { %v258_v35 = vmul.f32 %v3421_v9, %v254_v33 }
 0xb7e   :  { %209 = vrot.lane.b32.xlu1 %v178_v3, %s3339_s17 }
 0xb82   :  { %1632 = vrot.lane.b32.xlu1 %v3589_v29, %s3344_s20 }
 0xb83   :  { %v3177_v31 = vpop.eup %3176 }
 0xb84   :  { %v1404_v32 = vmul.f32 %v3177_v31, %v3173_v13 }
 0xb86   :  { %3046 = vmatmul.mubr.msk.f32.vlgmr.msra.gmra.mxu0 %vm438_vm3, %v1404_v32 }
 0xb87   :  { %3055 = vmatprep.mubr.msk.f32.mxu0 %vm3343_vm1, %v3341_v14 }
 0xbec   :  { %v272_v36 = vpop.permute.xlu1 %271 }
 0xbed   :  { %v3597_v37 = vadd.f32 %v272_v36, %v258_v35 }
 0xbef   :  { %1554 = vrot.lane.b32.xlu0 %v3597_v37, %s3344_s20 }
 0xbf0   :  { %v210_v39 = vpop.permute.xlu1 %209 }
 0xbf1   :  { %v214_v41 = vmul.f32 %v3421_v9, %v210_v39 }
 0xbf3   :  { %219 = vrot.lane.b32.xlu1 %v214_v41, %s3342_s19  ;;  %197 = vrot.lane.b32.xlu0 %v192_v40, %s3342_s19 }
 0xbf4   :  { %v1633_v43 = vpop.permute.xlu1 %1632 }
 0xc46   :  { %v1474_v42 = vpop.f32.mrf.mxu0 }
 0xc47   :  { %3051 = vmatmul.mubr.msk.f32.vlgmr.msra.gmra.mxu1 %vm438_vm3, %v1474_v42 }
 0xc48   :  { %3059 = vmatpush3.xpose.msk.msra.mxu1 %vm284_vm2, %v1633_v43  ;;  %v3047_v44 = vpop.f32.mrf.mxu0  ;;  %3060 = vmatprep.mubr.msk.f32.mxu1 %vm3343_vm1, %v3341_v14 }
 0xc49   :  { %3068 = vmatprep.subr.mxu1 %v3341_v14 }
 0xc61   :  { %v1555_v30 = vpop.permute.xlu0 %1554 }
 0xc62   :  { %3054 = vmatpush3.xpose.msk.msra.mxu0 %vm284_vm2, %v1555_v30 }
 0xc63   :  { %3063 = vmatprep.subr.mxu0 %v3341_v14 }
 0xc65   :  { %v220_v47 = vpop.permute.xlu1 %219  ;;  %v198_v48 = vpop.permute.xlu0 %197 }
 0xc66   :  { %v3615_v49 = vadd.f32 %v220_v47, %v204_v34  ;;  %v3617_v50 = vsub.f32 %v182_v46, %v198_v48 }
 0xc68   :  { %3056 = vmatmul.mubr.msk.f32.vlgmr.msra.gmra.mxu0 %vm284_vm2, %v3615_v49  ;;  %3061 = vmatmul.mubr.msk.f32.vlgmr.msra.gmra.mxu1 %vm284_vm2, %v3617_v50 }
 0xc69   :  { %3069 = vmatpush3.xpose.msk.msra.mxu1 %vm284_vm2, %v1555_v30  ;;  %3070 = vmatprep.mubr.msk.f32.mxu1 %vm3343_vm1, %v3341_v14 }
 0xc6a   :  { %3078 = vmatprep.subr.mxu1 %v3341_v14  ;;  %3065 = vmatprep.mubr.msk.f32.mxu0 %vm3343_vm1, %v3341_v14 }
 0xd07   :  { %v1547_v51 = vpop.f32.mrf.mxu1 }
 0xd08   :  { %v1551_v11 = vadd.f32 %v1547_v51, %v3565_v60 }
 0xd09   :  { %v3052_v52 = vpop.f32.mrf.mxu1 }
 0xd0a   :  { %1552 = vst.msk [vmem:[#allocation11] sm:$0xff] %vm95_vm0, %v1551_v11 }
 0xd28   :  { %v1627_v53 = vpop.f32.mrf.mxu0  ;;  %v1705_v54 = vpop.f32.mrf.mxu1 }
 0xd29   :  { %v1706_v55 = vadd.f32 %v1705_v54, %v1627_v53 }
 0xd2a   :  { %v3057_v56 = vpop.f32.mrf.mxu0  ;;  %v3062_v57 = vpop.f32.mrf.mxu1 }
 0xd2b   :  { %v1709_v58 = vsel %vm438_vm3, %v1706_v55, -inf }
 0xd2c   :  { %1710 = vmax.xlane.f32.xlu0 %v1709_v58 }
 0xd42   :  { %1727 = vrot.lane.b32.xlu0 %v3421_v9, %s3345_s21 }
 0xd46   :  { %1877 = vrot.lane.b32.xlu0 %v3617_v50, %s3346_s22 }
 0xdb5   :  { %v1711_v59 = vpop.xlane.xlu0 %1710 }
 0xdb6   :  { %v1712_v61 = vmax.f32 %v1711_v59, 0.0 }
 0xdb8   :  { %v1713_v60 = vsub.f32 %v1706_v55, %v1712_v61  ;;  %v1719_v2 = vsub.f32 0.0, %v1712_v61 }
 0xdb9   :  { %v1728_v62 = vpop.permute.xlu0 %1727 }
 0xdba   :  { %v1714_v63 = vmul.f32 1.442695, %v1713_v60  ;;  %3064 = vmatpush3.msra.mxu0 %v1728_v62  ;;  %v1720_v3 = vmul.f32 1.442695, %v1719_v2 }
 0xdbb   :  { %3073 = vmatprep.subr.mxu0 %v3341_v14 }
 0xdbc   :  { %3178 = vpow2.f32 %v1714_v63 }
 0xdbd   :  { %3180 = vpow2.f32 %v1720_v3  ;;  %v1878_v15 = vpop.permute.xlu0 %1877 }
 0xdc9   :  { %v3179_v0 = vpop.eup %3178 }
 0xdca   :  { %v1716_v1 = vsel %vm438_vm3, %v3179_v0, 0.0  ;;  %v3181_v4 = vpop.eup %3180 }
 0xdcb   :  { %1717 = vadd.xlane.f32.xlu1 %v1716_v1  ;;  %v1722_v5 = vmul.f32 4.0, %v3181_v4 }
 0xddc   :  { %1803 = vrot.lane.b32.xlu1 %v3615_v49, %s3346_s22 }
 0xe54   :  { %v1718_v6 = vpop.xlane.xlu1 %1717 }
 0xe55   :  { %v1723_v7 = vadd.f32 %v1722_v5, %v1718_v6 }
 0xe57   :  { %3182 = vrcp.f32 %v1723_v7 }
 0xe58   :  { %v1804_v10 = vpop.permute.xlu1 %1803 }
 0xe59   :  { %3071 = vmatmul.mubr.msk.f32.vlgmr.msra.gmra.mxu1 %vm284_vm2, %v1804_v10 }
 0xe5a   :  { %3079 = vmatpush3.msra.mxu1 %v1728_v62  ;;  %3080 = vmatprep.mubr.msk.f32.mxu1 %vm3343_vm1, %v3341_v14 }
 0xe5b   :  { %3088 = vmatprep.subr.mxu1 %v3341_v14 }
 0xe64   :  { %v3183_v12 = vpop.eup %3182 }
 0xe65   :  { %v1725_v13 = vmul.f32 %v3183_v12, %v3179_v0 }
 0xe67   :  { %3066 = vmatmul.mubr.msk.f32.vlgmr.msra.gmra.mxu0 %vm438_vm3, %v1725_v13 }
 0xe68   :  { %3074 = vmatpush3.xpose.msk.msra.mxu0 %vm284_vm2, %v1633_v43  ;;  %3075 = vmatprep.mubr.msk.f32.mxu0 %vm3343_vm1, %v3341_v14 }
 0xe69   :  { %3083 = vmatprep.subr.mxu0 %v3341_v14 }
 0xe6b   :  { %3076 = vmatmul.mubr.msk.f32.vlgmr.msra.gmra.mxu0 %vm284_vm2, %v1878_v15 }
 0xe6c   :  { %3084 = vmatpush3.msra.mxu0 %v3504_v8  ;;  %3085 = vmatprep.mubr.msk.f32.mxu0 %vm3343_vm1, %v3341_v14 }
 0xe6d   :  { %3093 = vmatprep.subr.mxu0 %v3341_v14 }
 0xf19   :  { %v1873_v16 = vpop.f32.mrf.mxu1 }
 0xf1b   :  { %v3072_v17 = vpop.f32.mrf.mxu1 }
 0xf27   :  { %v1799_v18 = vpop.f32.mrf.mxu0 }
 0xf29   :  { %v3067_v19 = vpop.f32.mrf.mxu0 }
 0xf2b   :  { %v1947_v21 = vpop.f32.mrf.mxu0 }
 0xf2c   :  { %v1948_v22 = vadd.f32 %v1947_v21, %v1873_v16 }
 0xf2d   :  { %v3077_v24 = vpop.f32.mrf.mxu0 }
 0xf2e   :  { %v1951_v25 = vsel %vm438_vm3, %v1948_v22, -inf }
 0xf2f   :  { %1952 = vmax.xlane.f32.xlu1 %v1951_v25 }
 0xf40   :  { %2267 = vrot.lane.b32.xlu1 %v3589_v29, %s3347_s25 }
 0xf44   :  { %2187 = vrot.lane.b32.xlu1 %v3615_v49, %s3340_s18 }
 0xfb8   :  { %v1953_v8 = vpop.xlane.xlu1 %1952 }
 0xfb9   :  { %v1954_v26 = vmax.f32 %v1953_v8, 0.0 }
 0xfbb   :  { %v1955_v27 = vsub.f32 %v1948_v22, %v1954_v26  ;;  %v1961_v33 = vsub.f32 0.0, %v1954_v26 }
 0xfbd   :  { %v1956_v28 = vmul.f32 1.442695, %v1955_v27  ;;  %v1962_v29 = vmul.f32 1.442695, %v1961_v33 }
 0xfbf   :  { %3184 = vpow2.f32 %v1956_v28 }
 0xfc0   :  { %3186 = vpow2.f32 %v1962_v29 }
 0xfcc   :  { %v3185_v31 = vpop.eup %3184 }
 0xfcd   :  { %v1958_v32 = vsel %vm438_vm3, %v3185_v31, 0.0  ;;  %v3187_v35 = vpop.eup %3186 }
 0xfce   :  { %1959 = vadd.xlane.f32.xlu0 %v1958_v32  ;;  %v1964_v36 = vmul.f32 4.0, %v3187_v35 }
 0xfe4   :  { %2189 = vrot.lane.b32.xlu0 %v3597_v37, %s3347_s25  ;;  %v3669_v37 = vpop.permute.xlu1 %2267 }
 0xfe8   :  { %2265 = vrot.lane.b32.xlu0 %v3617_v50, %s3340_s18  ;;  %v2188_v30 = vpop.permute.xlu1 %2187 }
0x1057   :  { %v1960_v38 = vpop.xlane.xlu0 %1959 }
0x1058   :  { %v1965_v39 = vadd.f32 %v1964_v36, %v1960_v38 }
0x105a   :  { %3188 = vrcp.f32 %v1965_v39 }
0x105b   :  { %v2190_v42 = vpop.permute.xlu0 %2189 }
0x105f   :  { %v2266_v43 = vpop.permute.xlu0 %2265 }
0x1067   :  { %v3189_v40 = vpop.eup %3188 }
0x1068   :  { %v1967_v41 = vmul.f32 %v3189_v40, %v3185_v31 }
0x106a   :  { %3081 = vmatmul.mubr.msk.f32.vlgmr.msra.gmra.mxu1 %vm438_vm3, %v1967_v41 }
0x106b   :  { %3089 = vmatpush3.msra.mxu1 %v3508_v20  ;;  %3090 = vmatprep.mubr.msk.f32.mxu1 %vm3343_vm1, %v3341_v14 }
0x106c   :  { %3098 = vmatprep.subr.mxu1 %v3341_v14 }
0x106e   :  { %3091 = vmatmul.mubr.msk.f32.vlgmr.msra.gmra.mxu1 %vm438_vm3, %v1799_v18 }
0x106f   :  { %3099 = vmatpush3.xpose.msk.msra.mxu1 %vm284_vm2, %v3669_v37  ;;  %3100 = vmatprep.mubr.msk.f32.mxu1 %vm3343_vm1, %v3341_v14 }
0x1070   :  { %3108 = vmatprep.subr.mxu1 %v3341_v14 }
0x1072   :  { %3101 = vmatmul.mubr.msk.f32.vlgmr.msra.gmra.mxu1 %vm284_vm2, %v2266_v43 }
0x1073   :  { %3109 = vmatpush3.msra.mxu1 %v3542_v45  ;;  %3110 = vmatprep.mubr.msk.f32.mxu1 %vm3343_vm1, %v3341_v14 }
0x1074   :  { %3118 = vmatprep.subr.mxu1 %v3341_v14 }
0x112a   :  { %v2037_v20 = vpop.f32.mrf.mxu1 }
0x112b   :  { %3086 = vmatmul.mubr.msk.f32.vlgmr.msra.gmra.mxu0 %vm438_vm3, %v2037_v20 }
0x112c   :  { %3094 = vmatpush3.xpose.msk.msra.mxu0 %vm284_vm2, %v2190_v42  ;;  %v3082_v44 = vpop.f32.mrf.mxu1  ;;  %3095 = vmatprep.mubr.msk.f32.mxu0 %vm3343_vm1, %v3341_v14 }
0x112d   :  { %3103 = vmatprep.subr.mxu0 %v3341_v14 }
0x112e   :  { %v2183_v34 = vpop.f32.mrf.mxu1 }
0x112f   :  { %3096 = vmatmul.mubr.msk.f32.vlgmr.msra.gmra.mxu0 %vm284_vm2, %v2188_v30 }
0x1130   :  { %v3092_v45 = vpop.f32.mrf.mxu1  ;;  %3105 = vmatprep.mubr.msk.f32.mxu0 %vm3343_vm1, %v3341_v14 }
0x1132   :  { %v2339_v46 = vpop.f32.mrf.mxu1 }
0x1134   :  { %v3102_v47 = vpop.f32.mrf.mxu1 }
0x11eb   :  { %v2110_v48 = vpop.f32.mrf.mxu0 }
0x11ec   :  { %v2184_v12 = vadd.f32 %v2183_v34, %v2110_v48 }
0x11ed   :  { %v3087_v51 = vpop.f32.mrf.mxu0 }
0x11ef   :  { %v2261_v11 = vpop.f32.mrf.mxu0 }
0x11f0   :  { %v2340_v52 = vadd.f32 %v2339_v46, %v2261_v11 }
0x11f1   :  { %v3097_v53 = vpop.f32.mrf.mxu0 }
0x11f2   :  { %v2343_v54 = vsel %vm438_vm3, %v2340_v52, -inf }
0x11f3   :  { %2344 = vmax.xlane.f32.xlu1 %v2343_v54 }
0x1204   :  { %2510 = vrot.lane.b32.xlu1 %v3615_v49, %s3348_s26 }
0x1208   :  { %2584 = vrot.lane.b32.xlu1 %v3617_v50, %s3348_s26 }
0x127c   :  { %v2345_v55 = vpop.xlane.xlu1 %2344 }
0x127d   :  { %v2346_v56 = vmax.f32 %v2345_v55, 0.0 }
0x127f   :  { %v2347_v57 = vsub.f32 %v2340_v52, %v2346_v56  ;;  %v2353_v60 = vsub.f32 0.0, %v2346_v56 }
0x1281   :  { %v2348_v58 = vmul.f32 1.442695, %v2347_v57  ;;  %v2354_v62 = vmul.f32 1.442695, %v2353_v60 }
0x1283   :  { %3190 = vpow2.f32 %v2348_v58 }
0x1284   :  { %3192 = vpow2.f32 %v2354_v62 }
0x1290   :  { %v3191_v59 = vpop.eup %3190 }
0x1291   :  { %v2350_v61 = vsel %vm438_vm3, %v3191_v59, 0.0  ;;  %v3193_v63 = vpop.eup %3192 }
0x1292   :  { %2351 = vadd.xlane.f32.xlu0 %v2350_v61  ;;  %v2356_v49 = vmul.f32 4.0, %v3193_v63 }
0x12a8   :  { %2360 = vrot.lane.b32.xlu0 %v3421_v9, %s3349_s27  ;;  %v2511_v9 = vpop.permute.xlu1 %2510 }
0x12ac   :  { %v2585_v6 = vpop.permute.xlu1 %2584 }
0x131b   :  { %v2352_v0 = vpop.xlane.xlu0 %2351 }
0x131c   :  { %v2357_v1 = vadd.f32 %v2356_v49, %v2352_v0 }
0x131e   :  { %3194 = vrcp.f32 %v2357_v1 }
0x131f   :  { %v2361_v50 = vpop.permute.xlu0 %2360 }
0x1320   :  { %3104 = vmatpush3.msra.mxu0 %v2361_v50 }
0x1321   :  { %3113 = vmatprep.subr.mxu0 %v3341_v14 }
0x132b   :  { %v3195_v2 = vpop.eup %3194 }
0x132c   :  { %v2359_v3 = vmul.f32 %v3195_v2, %v3191_v59 }
0x132e   :  { %3106 = vmatmul.mubr.msk.f32.vlgmr.msra.gmra.mxu0 %vm438_vm3, %v2359_v3 }
0x132f   :  { %3114 = vmatpush3.xpose.msk.msra.mxu0 %vm284_vm2, %v2190_v42  ;;  %3115 = vmatprep.mubr.msk.f32.mxu0 %vm3343_vm1, %v3341_v14 }
0x1330   :  { %3123 = vmatprep.subr.mxu0 %v3341_v14 }
0x1332   :  { %3116 = vmatmul.mubr.msk.f32.vlgmr.msra.gmra.mxu0 %vm284_vm2, %v2511_v9 }
0x1333   :  { %3124 = vmatpush3.msra.mxu0 %v2361_v50  ;;  %3125 = vmatprep.mubr.msk.f32.mxu0 %vm3343_vm1, %v3341_v14 }
0x13ee   :  { %v2432_v4 = vpop.f32.mrf.mxu0 }
0x13ef   :  { %3111 = vmatmul.mubr.msk.f32.vlgmr.msra.gmra.mxu1 %vm438_vm3, %v2432_v4 }
0x13f0   :  { %3119 = vmatpush3.xpose.msk.msra.mxu1 %vm284_vm2, %v3669_v37  ;;  %v3107_v5 = vpop.f32.mrf.mxu0  ;;  %3120 = vmatprep.mubr.msk.f32.mxu1 %vm3343_vm1, %v3341_v14 }
0x13f1   :  { %3128 = vmatprep.subr.mxu1 %v3341_v14 }
0x13f2   :  { %v2580_v7 = vpop.f32.mrf.mxu0 }
0x13f3   :  { %3121 = vmatmul.mubr.msk.f32.vlgmr.msra.gmra.mxu1 %vm284_vm2, %v2585_v6 }
0x13f4   :  { %v3117_v10 = vpop.f32.mrf.mxu0  ;;  %3129 = vmatpush3.msra.mxu1 %v3581_v23  ;;  %3130 = vmatprep.mubr.msk.f32.mxu1 %vm3343_vm1, %v3341_v14 }
0x14af   :  { %v2505_v13 = vpop.f32.mrf.mxu1 }
0x14b0   :  { %v2509_v15 = vadd.f32 %v2505_v13, %v2184_v12 }
0x14b1   :  { %v3112_v16 = vpop.f32.mrf.mxu1 }
0x14b3   :  { %v2654_v17 = vpop.f32.mrf.mxu1 }
0x14b4   :  { %v2655_v18 = vadd.f32 %v2654_v17, %v2580_v7 }
0x14b5   :  { %v3122_v19 = vpop.f32.mrf.mxu1 }
0x14b6   :  { %v2658_v21 = vsel %vm438_vm3, %v2655_v18, -inf }
0x14b7   :  { %2659 = vmax.xlane.f32.xlu0 %v2658_v21 }
0x1540   :  { %v2660_v22 = vpop.xlane.xlu0 %2659 }
0x1541   :  { %v2661_v24 = vmax.f32 %v2660_v22, 0.0 }
0x1543   :  { %v2662_v25 = vsub.f32 %v2655_v18, %v2661_v24  ;;  %v2668_v14 = vsub.f32 0.0, %v2661_v24 }
0x1545   :  { %v2663_v8 = vmul.f32 1.442695, %v2662_v25  ;;  %v2669_v27 = vmul.f32 1.442695, %v2668_v14 }
0x1547   :  { %3196 = vpow2.f32 %v2663_v8 }
0x1548   :  { %3198 = vpow2.f32 %v2669_v27 }
0x1554   :  { %v3197_v26 = vpop.eup %3196 }
0x1555   :  { %v2665_v23 = vsel %vm438_vm3, %v3197_v26, 0.0  ;;  %v3199_v28 = vpop.eup %3198 }
0x1556   :  { %2666 = vadd.xlane.f32.xlu1 %v2665_v23  ;;  %v2671_v31 = vmul.f32 4.0, %v3199_v28 }
0x15df   :  { %v2667_v32 = vpop.xlane.xlu1 %2666 }
0x15e0   :  { %v2672_v33 = vadd.f32 %v2671_v31, %v2667_v32 }
0x15e2   :  { %3200 = vrcp.f32 %v2672_v33 }
0x15ef   :  { %v3201_v29 = vpop.eup %3200 }
0x15f0   :  { %v2674_v35 = vmul.f32 %v3201_v29, %v3197_v26 }
0x15f2   :  { %3126 = vmatmul.mubr.msk.f32.vlgmr.msra.gmra.mxu0 %vm438_vm3, %v2674_v35 }
0x16b2   :  { %v2744_v36 = vpop.f32.mrf.mxu0 }
0x16b3   :  { %3131 = vmatmul.mubr.msk.f32.vlgmr.msra.gmra.mxu1 %vm438_vm3, %v2744_v36 }
0x16b4   :  { %v3127_v38 = vpop.f32.mrf.mxu0 }
0x1773   :  { %v2817_v39 = vpop.f32.mrf.mxu1 }
0x1774   :  { %v2821_v40 = vadd.f32 %v2817_v39, %v2509_v15 }
0x1775   :  { %v3132_v41 = vpop.f32.mrf.mxu1 }
0x1776   :  { %2822 = vst.msk [vmem:[#allocation11 + $0x8] sm:$0xff] %vm95_vm0, %v2821_v40 }
0x1777   :  { %3313 = shalt.err (!%p3310_p1)
}
0x1778   :  { %2834 = dma.vmem_to_hbm [thread:$0]  %s2829_s29, 256, %s3733_s5, [#allocation4], %s3332_s23, %s3332_s23, %s3333_s24  }
0x1779   :  { %3328 = dma.done.wait [#allocation4], 256  }
0x177a   :  { %3329 = vsyncadd [#allocation4], 4294967040 }
0x177b   :  { %2838 = vsyncpa [#allocation3], 1 }
0x177c   :  { %2839 = vsyncpa [#allocation6], 1 }
0x177d   :  { %2840 = vsyncpa [#allocation9], 1 }
0x177e   :  { %2841 = vsyncpa [#allocation4], 1 }

</bundles_post_ra>
